<compile_context>
chip_gen: v7x
topology: tpu7x:2x2x1
jax: 0.10.0
libtpu: 0.0.40
codegen_flags: <defaults>
</compile_context>

<pallas_src>
import jax
import jax.numpy as jnp
from jax.experimental import pallas as pl
from jax.experimental.pallas import tpu as pltpu


def cvae_kernel(
    x_ref, eps_ref, enc_bias_ref, dec_bias_ref,      # batch-tiled inputs
    enc_wx_ref, mlv_w_ref, mlv_b_ref,                # resident weights
    dec_wz_ref, dec_wo_ref, dec_b2_ref,
    gen_ref, mlv_ref,                                # batch-tiled outputs
):
    L = eps_ref.shape[1]

    x = x_ref[...]            # (TB, D)  bf16
    eps = eps_ref[...]        # (TB, L)  f32

    # Encoder hidden: relu(x @ Wx + bias_row(class)).  The one-hot matmul
    # y @ W_y is pre-folded into enc_bias (a gathered row of W_y + b).
    h = jnp.dot(x, enc_wx_ref[...], preferred_element_type=jnp.float32)
    h = jnp.maximum(h + enc_bias_ref[...], 0.0)

    # Fused mu|logvar projection -> one lane-dense (TB, 2L) slab.
    mlv = (
        jnp.dot(h.astype(mlv_w_ref.dtype), mlv_w_ref[...],
                preferred_element_type=jnp.float32)
        + mlv_b_ref[...]
    )
    mu = mlv[:, :L]
    logvar = mlv[:, L:]

    # Reparameterization in f32: z = eps * exp(logvar / 2) + mu
    z = eps * jnp.exp(logvar * 0.5) + mu

    # Decoder hidden: relu(z @ Wz + bias_row(class)).
    h2 = jnp.dot(z.astype(dec_wz_ref.dtype), dec_wz_ref[...],
                 preferred_element_type=jnp.float32)
    h2 = jnp.maximum(h2 + dec_bias_ref[...], 0.0)

    logits = (
        jnp.dot(h2.astype(dec_wo_ref.dtype), dec_wo_ref[...],
                preferred_element_type=jnp.float32)
        + dec_b2_ref[...]
    )

    gen_ref[...] = jax.nn.sigmoid(logits).astype(gen_ref.dtype)
    mlv_ref[...] = mlv.astype(mlv_ref.dtype)


def cvae_forward(x, y_idx, eps, params, *, tb=128):
    """x: (B, D) f32, y_idx: (B, 1) int32, eps: (B, L) f32.

    Returns (generated_x, z_mu, z_var) matching the PyTorch CVAE.forward.
    """
    B, D = x.shape
    L = eps.shape[1]
    H = params["enc_wx"].shape[1]
    bf = jnp.bfloat16

    # Fold one-hot matmuls into gathered per-sample bias rows (row gather).
    cls = y_idx[:, 0]
    enc_bias = (params["enc_wy"] + params["enc_b"])[cls]       # (B, H) f32
    dec_bias = (params["dec_wy"] + params["dec_b1"])[cls]      # (B, H) f32

    # Fuse mu / logvar projections into a single (H, 2L) weight + (1, 2L) bias.
    mlv_w = jnp.concatenate([params["mu_w"], params["var_w"]], axis=1).astype(bf)
    mlv_b = jnp.concatenate([params["mu_b"], params["var_b"]], axis=1)

    enc_wx = params["enc_wx"].astype(bf)
    dec_wz = params["dec_wz"].astype(bf)
    dec_wo = params["dec_wo"].astype(bf)
    dec_b2 = params["dec_b2"]

    # Pad the batch up to a multiple of the batch tile (MXU-friendly TB=128).
    nb = pl.cdiv(B, tb)
    Bp = nb * tb
    pad = Bp - B
    x_b = x.astype(bf)
    eps_p = eps
    if pad:
        x_b = jnp.pad(x_b, ((0, pad), (0, 0)))
        eps_p = jnp.pad(eps_p, ((0, pad), (0, 0)))
        enc_bias = jnp.pad(enc_bias, ((0, pad), (0, 0)))
        dec_bias = jnp.pad(dec_bias, ((0, pad), (0, 0)))

    def batch_spec(d):
        return pl.BlockSpec((tb, d), lambda i: (i, 0))

    def full_spec(a):
        # Whole array resident in VMEM across all grid steps.
        return pl.BlockSpec(a.shape, lambda i: (0, 0))

    flops = 2 * Bp * (D * H + H * 2 * L + L * H + H * D)
    transcendentals = Bp * (L + D)
    bytes_accessed = (
        x_b.size * 2
        + (eps_p.size + enc_bias.size + dec_bias.size) * 4
        + (enc_wx.size + mlv_w.size + dec_wz.size + dec_wo.size) * 2
        + (mlv_b.size + dec_b2.size) * 4
        + Bp * D * 4 + Bp * 2 * L * 4
    )

    gen, mlv = pl.pallas_call(
        cvae_kernel,
        grid=(nb,),
        in_specs=[
            batch_spec(D),            # x
            batch_spec(L),            # eps
            batch_spec(H),            # enc class-bias rows
            batch_spec(H),            # dec class-bias rows
            full_spec(enc_wx),
            full_spec(mlv_w),
            full_spec(mlv_b),
            full_spec(dec_wz),
            full_spec(dec_wo),
            full_spec(dec_b2),
        ],
        out_specs=(
            pl.BlockSpec((tb, D), lambda i: (i, 0)),
            pl.BlockSpec((tb, 2 * L), lambda i: (i, 0)),
        ),
        out_shape=(
            jax.ShapeDtypeStruct((Bp, D), jnp.float32),       # generated_x
            jax.ShapeDtypeStruct((Bp, 2 * L), jnp.float32),   # packed mu|logvar
        ),
        compiler_params=pltpu.CompilerParams(
            dimension_semantics=("parallel",),
            vmem_limit_bytes=32 * 1024 * 1024,   # fits v7x 64 MiB budget too
        ),
        cost_estimate=pl.CostEstimate(
            flops=flops,
            transcendentals=transcendentals,
            bytes_accessed=bytes_accessed,
        ),
    )(x_b, eps_p, enc_bias, dec_bias,
      enc_wx, mlv_w, mlv_b, dec_wz, dec_wo, dec_b2)

    generated_x = gen[:B]
    z_mu = mlv[:B, :L]
    z_var = mlv[:B, L:]
    return generated_x, z_mu, z_var


def init_params(key, input_dim, hidden_dim, latent_dim, n_classes):
    ks = jax.random.split(key, 5)

    def lin(k, fan_in, fan_out):
        # PyTorch-Linear-like uniform init, stored (in, out).
        bound = 1.0 / jnp.sqrt(fan_in)
        kw, kb = jax.random.split(k)
        w = jax.random.uniform(kw, (fan_in, fan_out), jnp.float32, -bound, bound)
        b = jax.random.uniform(kb, (1, fan_out), jnp.float32, -bound, bound)
        return w, b

    # Encoder linear over concatenated [x, y]: split into x-part and y-part.
    w_enc, b_enc = lin(ks[0], input_dim + n_classes, hidden_dim)
    enc_wx, enc_wy = w_enc[:input_dim], w_enc[input_dim:]
    mu_w, mu_b = lin(ks[1], hidden_dim, latent_dim)
    var_w, var_b = lin(ks[2], hidden_dim, latent_dim)
    # Decoder linear over concatenated [z, y]: split into z-part and y-part.
    w_dec, b_dec = lin(ks[3], latent_dim + n_classes, hidden_dim)
    dec_wz, dec_wy = w_dec[:latent_dim], w_dec[latent_dim:]
    dec_wo, dec_b2 = lin(ks[4], hidden_dim, input_dim)

    return dict(
        enc_wx=enc_wx, enc_wy=enc_wy, enc_b=b_enc,
        mu_w=mu_w, mu_b=mu_b,
        var_w=var_w, var_b=var_b,
        dec_wz=dec_wz, dec_wy=dec_wy, dec_b1=b_dec,
        dec_wo=dec_wo, dec_b2=dec_b2,
    )


def reference_forward(x, y_idx, eps, p):
    # Pure-JAX reference mirroring the PyTorch module, with the same bf16
    # operand precision as the kernel (f32 accumulation).
    bf = jnp.bfloat16
    cls = y_idx[:, 0]
    enc_bias = (p["enc_wy"] + p["enc_b"])[cls]
    dec_bias = (p["dec_wy"] + p["dec_b1"])[cls]
    h = jax.nn.relu(
        jnp.dot(x.astype(bf), p["enc_wx"].astype(bf),
                preferred_element_type=jnp.float32) + enc_bias)
    mu = jnp.dot(h.astype(bf), p["mu_w"].astype(bf),
                 preferred_element_type=jnp.float32) + p["mu_b"]
    logvar = jnp.dot(h.astype(bf), p["var_w"].astype(bf),
                     preferred_element_type=jnp.float32) + p["var_b"]
    z = eps * jnp.exp(logvar * 0.5) + mu
    h2 = jax.nn.relu(
        jnp.dot(z.astype(bf), p["dec_wz"].astype(bf),
                preferred_element_type=jnp.float32) + dec_bias)
    gen = jax.nn.sigmoid(
        jnp.dot(h2.astype(bf), p["dec_wo"].astype(bf),
                preferred_element_type=jnp.float32) + p["dec_b2"])
    return gen, mu, logvar


if __name__ == "__main__":
    # Small, 128-aligned shapes consistent with the module (MNIST-ish, tiny).
    B = 200            # non-multiple of the 128 batch tile -> exercises padding
    INPUT_DIM = 256    # small flattened image
    HIDDEN_DIM = 128
    LATENT_DIM = 64    # packed mu|logvar slab is 2L = 128 (lane-dense)
    N_CLASSES = 10

    key = jax.random.PRNGKey(0)
    k_x, k_y, k_eps, k_p = jax.random.split(key, 4)

    x = jax.random.uniform(k_x, (B, INPUT_DIM), jnp.float32)
    y_idx = jax.random.randint(k_y, (B, 1), 0, N_CLASSES)
    eps = jax.random.normal(k_eps, (B, LATENT_DIM), jnp.float32)

    params = init_params(k_p, INPUT_DIM, HIDDEN_DIM, LATENT_DIM, N_CLASSES)

    gen_x, z_mu, z_var = cvae_forward(x, y_idx, eps, params)
    jax.block_until_ready((gen_x, z_mu, z_var))

    # Sanity check against the precision-matched pure-JAX reference.
    ref_gen, ref_mu, ref_var = reference_forward(x, y_idx, eps, params)
    assert gen_x.shape == (B, INPUT_DIM)
    assert z_mu.shape == (B, LATENT_DIM) and z_var.shape == (B, LATENT_DIM)
    assert jnp.allclose(gen_x, ref_gen, atol=2e-3, rtol=2e-3)
    assert jnp.allclose(z_mu, ref_mu, atol=2e-3, rtol=2e-3)
    assert jnp.allclose(z_var, ref_var, atol=2e-3, rtol=2e-3)

    print("KERNEL_OK")
</pallas_src>

<mosaic_0001>
module attributes {stable_mosaic.version = 11 : i64} {
  func.func @cvae_kernel(%arg0: i32, %arg1: memref<128x256xbf16, #tpu.memory_space<vmem>>, %arg2: memref<128x64xf32, #tpu.memory_space<vmem>>, %arg3: memref<128x128xf32, #tpu.memory_space<vmem>>, %arg4: memref<128x128xf32, #tpu.memory_space<vmem>>, %arg5: memref<256x128xbf16, #tpu.memory_space<vmem>>, %arg6: memref<128x128xbf16, #tpu.memory_space<vmem>>, %arg7: memref<1x128xf32, #tpu.memory_space<vmem>>, %arg8: memref<64x128xbf16, #tpu.memory_space<vmem>>, %arg9: memref<128x256xbf16, #tpu.memory_space<vmem>>, %arg10: memref<1x256xf32, #tpu.memory_space<vmem>>, %arg11: memref<128x256xf32, #tpu.memory_space<vmem>>, %arg12: memref<128x128xf32, #tpu.memory_space<vmem>>) attributes {dimension_semantics = [#tpu.dimension_semantics<parallel>], iteration_bounds = array<i64: 2>, scalar_prefetch = 0 : i64, scratch_operands = 0 : i64, tpu.core_type = #tpu.core_type<tc>, window_params = [{transform_indices = @transform_0, window_bounds = array<i64: 128, 256>}, {transform_indices = @transform_1, window_bounds = array<i64: 128, 64>}, {transform_indices = @transform_2, window_bounds = array<i64: 128, 128>}, {transform_indices = @transform_3, window_bounds = array<i64: 128, 128>}, {pipeline_mode = #tpu.pipeline_mode<synchronous>, transform_indices = @transform_4, window_bounds = array<i64: 256, 128>}, {pipeline_mode = #tpu.pipeline_mode<synchronous>, transform_indices = @transform_5, window_bounds = array<i64: 128, 128>}, {pipeline_mode = #tpu.pipeline_mode<synchronous>, transform_indices = @transform_6, window_bounds = array<i64: 1, 128>}, {pipeline_mode = #tpu.pipeline_mode<synchronous>, transform_indices = @transform_7, window_bounds = array<i64: 64, 128>}, {pipeline_mode = #tpu.pipeline_mode<synchronous>, transform_indices = @transform_8, window_bounds = array<i64: 128, 256>}, {pipeline_mode = #tpu.pipeline_mode<synchronous>, transform_indices = @transform_9, window_bounds = array<i64: 1, 256>}, {transform_indices = @transform_10, window_bounds = array<i64: 128, 256>}, {transform_indices = @transform_11, window_bounds = array<i64: 128, 128>}]} {
    %c0 = arith.constant 0 : index
    %c0_0 = arith.constant 0 : index
    %0 = vector.load %arg1[%c0, %c0_0] : memref<128x256xbf16, #tpu.memory_space<vmem>>, vector<128x256xbf16>
    %c0_1 = arith.constant 0 : index
    %c0_2 = arith.constant 0 : index
    %1 = vector.load %arg2[%c0_1, %c0_2] : memref<128x64xf32, #tpu.memory_space<vmem>>, vector<128x64xf32>
    %c0_3 = arith.constant 0 : index
    %c0_4 = arith.constant 0 : index
    %2 = vector.load %arg5[%c0_3, %c0_4] : memref<256x128xbf16, #tpu.memory_space<vmem>>, vector<256x128xbf16>
    %cst = arith.constant dense<0.000000e+00> : vector<128x128xf32>
    %3 = tpu.matmul %0, %2, %cst {dimension_numbers = #tpu.dot_dimension_numbers<[1], [0], [0], [1], [0, 0, 1, 1], [], []>} : vector<128x256xbf16>, vector<256x128xbf16>, vector<128x128xf32> -> vector<128x128xf32>
    %c0_5 = arith.constant 0 : index
    %c0_6 = arith.constant 0 : index
    %4 = vector.load %arg3[%c0_5, %c0_6] : memref<128x128xf32, #tpu.memory_space<vmem>>, vector<128x128xf32>
    %5 = arith.addf %3, %4 : vector<128x128xf32>
    %cst_7 = arith.constant 0.000000e+00 : f32
    %6 = vector.broadcast %cst_7 : f32 to vector<128x128xf32>
    %7 = arith.maximumf %5, %6 : vector<128x128xf32>
    %8 = arith.truncf %7 : vector<128x128xf32> to vector<128x128xbf16>
    %c0_8 = arith.constant 0 : index
    %c0_9 = arith.constant 0 : index
    %9 = vector.load %arg6[%c0_8, %c0_9] : memref<128x128xbf16, #tpu.memory_space<vmem>>, vector<128x128xbf16>
    %cst_10 = arith.constant dense<0.000000e+00> : vector<128x128xf32>
    %10 = tpu.matmul %8, %9, %cst_10 {dimension_numbers = #tpu.dot_dimension_numbers<[1], [0], [0], [1], [0, 0, 1, 1], [], []>} : vector<128x128xbf16>, vector<128x128xbf16>, vector<128x128xf32> -> vector<128x128xf32>
    %c0_11 = arith.constant 0 : index
    %c0_12 = arith.constant 0 : index
    %11 = vector.load %arg7[%c0_11, %c0_12] : memref<1x128xf32, #tpu.memory_space<vmem>>, vector<1x128xf32>
    %12 = vector.broadcast %11 : vector<1x128xf32> to vector<128x128xf32>
    %13 = arith.addf %10, %12 : vector<128x128xf32>
    %14 = vector.extract_strided_slice %13 {offsets = [0, 0], sizes = [128, 64], strides = [1, 1]} : vector<128x128xf32> to vector<128x64xf32>
    %15 = vector.extract_strided_slice %13 {offsets = [0, 64], sizes = [128, 64], strides = [1, 1]} : vector<128x128xf32> to vector<128x64xf32>
    %cst_13 = arith.constant 5.000000e-01 : f32
    %16 = vector.broadcast %cst_13 : f32 to vector<128x64xf32>
    %17 = arith.mulf %15, %16 : vector<128x64xf32>
    %18 = math.exp %17 : vector<128x64xf32>
    %19 = arith.mulf %1, %18 : vector<128x64xf32>
    %20 = arith.addf %19, %14 : vector<128x64xf32>
    %21 = arith.truncf %20 : vector<128x64xf32> to vector<128x64xbf16>
    %c0_14 = arith.constant 0 : index
    %c0_15 = arith.constant 0 : index
    %22 = vector.load %arg8[%c0_14, %c0_15] : memref<64x128xbf16, #tpu.memory_space<vmem>>, vector<64x128xbf16>
    %cst_16 = arith.constant dense<0.000000e+00> : vector<128x128xf32>
    %23 = tpu.matmul %21, %22, %cst_16 {dimension_numbers = #tpu.dot_dimension_numbers<[1], [0], [0], [1], [0, 0, 1, 1], [], []>} : vector<128x64xbf16>, vector<64x128xbf16>, vector<128x128xf32> -> vector<128x128xf32>
    %c0_17 = arith.constant 0 : index
    %c0_18 = arith.constant 0 : index
    %24 = vector.load %arg4[%c0_17, %c0_18] : memref<128x128xf32, #tpu.memory_space<vmem>>, vector<128x128xf32>
    %25 = arith.addf %23, %24 : vector<128x128xf32>
    %cst_19 = arith.constant 0.000000e+00 : f32
    %26 = vector.broadcast %cst_19 : f32 to vector<128x128xf32>
    %27 = arith.maximumf %25, %26 : vector<128x128xf32>
    %28 = arith.truncf %27 : vector<128x128xf32> to vector<128x128xbf16>
    %c0_20 = arith.constant 0 : index
    %c0_21 = arith.constant 0 : index
    %29 = vector.load %arg9[%c0_20, %c0_21] : memref<128x256xbf16, #tpu.memory_space<vmem>>, vector<128x256xbf16>
    %cst_22 = arith.constant dense<0.000000e+00> : vector<128x256xf32>
    %30 = tpu.matmul %28, %29, %cst_22 {dimension_numbers = #tpu.dot_dimension_numbers<[1], [0], [0], [1], [0, 0, 1, 1], [], []>} : vector<128x128xbf16>, vector<128x256xbf16>, vector<128x256xf32> -> vector<128x256xf32>
    %c0_23 = arith.constant 0 : index
    %c0_24 = arith.constant 0 : index
    %31 = vector.load %arg10[%c0_23, %c0_24] : memref<1x256xf32, #tpu.memory_space<vmem>>, vector<1x256xf32>
    %32 = vector.broadcast %31 : vector<1x256xf32> to vector<128x256xf32>
    %33 = arith.addf %30, %32 : vector<128x256xf32>
    %34 = arith.negf %33 : vector<128x256xf32>
    %35 = math.exp %34 : vector<128x256xf32>
    %cst_25 = arith.constant 1.000000e+00 : f32
    %36 = vector.broadcast %cst_25 : f32 to vector<128x256xf32>
    %37 = arith.addf %36, %35 : vector<128x256xf32>
    %38 = arith.divf %36, %37 : vector<128x256xf32>
    %c0_26 = arith.constant 0 : index
    %c0_27 = arith.constant 0 : index
    %39 = vector.load %arg11[%c0_26, %c0_27] : memref<128x256xf32, #tpu.memory_space<vmem>>, vector<128x256xf32>
    tpu.vector_store %arg11[%c0_26, %c0_27], %38 {strides = array<i32>} : memref<128x256xf32, #tpu.memory_space<vmem>>, vector<128x256xf32>,
    %c0_28 = arith.constant 0 : index
    %c0_29 = arith.constant 0 : index
    %40 = vector.load %arg12[%c0_28, %c0_29] : memref<128x128xf32, #tpu.memory_space<vmem>>, vector<128x128xf32>
    tpu.vector_store %arg12[%c0_28, %c0_29], %13 {strides = array<i32>} : memref<128x128xf32, #tpu.memory_space<vmem>>, vector<128x128xf32>,
    return
  }
  func.func @transform_0(%arg0: i32) -> (i32, i32) {
    %c0_i32 = arith.constant 0 : i32
    %c0_i32_0 = arith.constant 0 : i32
    return %arg0, %c0_i32 : i32, i32
  }
  func.func @transform_1(%arg0: i32) -> (i32, i32) {
    %c0_i32 = arith.constant 0 : i32
    %c0_i32_0 = arith.constant 0 : i32
    return %arg0, %c0_i32 : i32, i32
  }
  func.func @transform_2(%arg0: i32) -> (i32, i32) {
    %c0_i32 = arith.constant 0 : i32
    %c0_i32_0 = arith.constant 0 : i32
    return %arg0, %c0_i32 : i32, i32
  }
  func.func @transform_3(%arg0: i32) -> (i32, i32) {
    %c0_i32 = arith.constant 0 : i32
    %c0_i32_0 = arith.constant 0 : i32
    return %arg0, %c0_i32 : i32, i32
  }
  func.func @transform_4(%arg0: i32) -> (i32, i32) {
    %c0_i32 = arith.constant 0 : i32
    %c0_i32_0 = arith.constant 0 : i32
    %c0_i32_1 = arith.constant 0 : i32
    return %c0_i32, %c0_i32_0 : i32, i32
  }
  func.func @transform_5(%arg0: i32) -> (i32, i32) {
    %c0_i32 = arith.constant 0 : i32
    %c0_i32_0 = arith.constant 0 : i32
    %c0_i32_1 = arith.constant 0 : i32
    return %c0_i32, %c0_i32_0 : i32, i32
  }
  func.func @transform_6(%arg0: i32) -> (i32, i32) {
    %c0_i32 = arith.constant 0 : i32
    %c0_i32_0 = arith.constant 0 : i32
    %c0_i32_1 = arith.constant 0 : i32
    return %c0_i32, %c0_i32_0 : i32, i32
  }
  func.func @transform_7(%arg0: i32) -> (i32, i32) {
    %c0_i32 = arith.constant 0 : i32
    %c0_i32_0 = arith.constant 0 : i32
    %c0_i32_1 = arith.constant 0 : i32
    return %c0_i32, %c0_i32_0 : i32, i32
  }
  func.func @transform_8(%arg0: i32) -> (i32, i32) {
    %c0_i32 = arith.constant 0 : i32
    %c0_i32_0 = arith.constant 0 : i32
    %c0_i32_1 = arith.constant 0 : i32
    return %c0_i32, %c0_i32_0 : i32, i32
  }
  func.func @transform_9(%arg0: i32) -> (i32, i32) {
    %c0_i32 = arith.constant 0 : i32
    %c0_i32_0 = arith.constant 0 : i32
    %c0_i32_1 = arith.constant 0 : i32
    return %c0_i32, %c0_i32_0 : i32, i32
  }
  func.func @transform_10(%arg0: i32) -> (i32, i32) {
    %c0_i32 = arith.constant 0 : i32
    %c0_i32_0 = arith.constant 0 : i32
    return %arg0, %c0_i32 : i32, i32
  }
  func.func @transform_11(%arg0: i32) -> (i32, i32) {
    %c0_i32 = arith.constant 0 : i32
    %c0_i32_0 = arith.constant 0 : i32
    return %arg0, %c0_i32 : i32, i32
  }
}

</mosaic_0001>

<bundles_post_ra>
// kernel: tpu_custom_call.1
= control target key start
LH: loop header
LB: loop body
LE: loop exit
PB: predicated region body
PF: predicated region fallthrough
CT: control target
= control target key end

     0   :  { %s3802_s0 = inlined_call_operand.vmem [shape: bf16[256,256], index: 0, kind: input, shape index: {}]   ;;  %s3803_s1 = inlined_call_operand.vmem [shape: f32[256,64], index: 1, kind: input, shape index: {}]   ;;  %s3804_s2 = inlined_call_operand.hbm [shape: f32[256,128], index: 2, kind: input, shape index: {}]   ;;  %s3805_s3 = inlined_call_operand.hbm [shape: f32[256,128], index: 3, kind: input, shape index: {}]   ;;  %s3806_s4 = inlined_call_operand.vmem [shape: bf16[256,128], index: 4, kind: input, shape index: {}]   ;;  %s3807_s5 = inlined_call_operand.hbm [shape: bf16[128,128], index: 5, kind: input, shape index: {}]   ;;  %s3808_s6 = inlined_call_operand.vmem [shape: f32[1,128], index: 6, kind: input, shape index: {}]   ;;  %s3809_s7 = inlined_call_operand.hbm [shape: bf16[64,128], index: 7, kind: input, shape index: {}]   ;;  %s3810_s8 = inlined_call_operand.hbm [shape: bf16[128,256], index: 8, kind: input, shape index: {}]   ;;  %s3811_s9 = inlined_call_operand.vmem [shape: f32[1,256], index: 9, kind: input, shape index: {}]   ;;  %s3812_s10 = inlined_call_operand.hbm [shape: f32[256,256], index: 10, kind: output, shape index: {0}]   ;;  %s3813_s11 = inlined_call_operand.hbm [shape: f32[256,128], index: 11, kind: output, shape index: {1}]  }
   0x1   :  { %3825 = sst [smem:[#allocation23_spill]] %s3804_s2 }
   0x2   :  { %3826 = sst [smem:[#allocation24_spill]] %s3807_s5 }
   0x3   :  { %3827 = sst [smem:[#allocation25_spill]] %s3809_s7 }
   0x4   :  { %3828 = sst [smem:[#allocation26_spill]] %s3810_s8 }
   0x5   :  { %3829 = sst [smem:[#allocation27_spill]] %s3811_s9 }
   0x6   :  { %3830 = sst [smem:[#allocation28_spill]] %s3812_s10 }
   0x7   :  { %3831 = sst [smem:[#allocation29_spill]] %s3813_s11 }
   0x8   :  { %17 = vsyncpa [#allocation3], 0 }
   0x9   :  { %19 = vsyncpa [#allocation3 + $0x1], 0 }
   0xa   :  { %20 = vsyncpa [#allocation6], 0 }
   0xb   :  { %22 = vsyncpa [#allocation6 + $0x1], 0 }
   0xc   :  { %23 = vsyncpa [#allocation9], 0 }
   0xd   :  { %24 = vsyncpa [#allocation4], 0 }
   0xe   :  { %26 = vsyncpa [#allocation4 + $0x1], 0 }
   0xf   :  { %27 = vsyncpa [#allocation13], 0 }
  0x10   :  { %29 = vsyncpa [#allocation13 + $0x1], 0  ;;  %s3090_s17 = smov 0   ;;  %s3092_s18 = smov 0  }
  0x11   :  { %s3094_s19 = smov 0   ;;  %s3096_s20 = smov 0  }
  0x12 LB: > { %3832 = sst [smem:[#allocation20_spill]] %s2999_s17  ;;  %s3111_s21 = sadd.s32 4294967295, %s3011_s20   ;;  %s3011_s20 = sphi %s3096_s20, %s3866_s20   ;;  %s3007_s19 = sphi %s3094_s19, %s3865_s19   ;;  %s3003_s18 = sphi %s3092_s18, %s3864_s18   ;;  %s2999_s17 = sphi %s3090_s17, %s3863_s17  }
  0x13   : > { %s2119_s22 = sadd.s32 4294967294, %s3011_s20   ;;  %p107_p0 = scmp.ne.s32.totalorder %s3003_s18, %s2999_s17 }
  0x14   : > { %p3815_p1 = scmp.eq.s32.totalorder %s3111_s21, 0  ;;  %p289_p3 = scmp.eq.s32.totalorder %s2119_s22, 1 }
  0x15   : > { %p2120_p5 = scmp.ge.s32.totalorder %s3011_s20, 1  ;;  %p322_p7 = scmp.lt.s32.totalorder %s3011_s20, 3 }
  0x16   : > { %p3120_p4 = por %p3815_p1, %p107_p0  ;;  %p3125_p6 = por %p289_p3, %p107_p0 }
  0x17   : > { %p3130_p8 = pnand %p2120_p5, %p322_p7  ;;  %s3013_s26 = smov [#allocation7]  }
  0x18   : > { %s3833_s23 = scalar_select %p3120_p4, 1, 0 }
  0x19   : > { %s3834_s24 = scalar_select %p3125_p6, 1, 0 }
  0x1a   : > { %s3836_s25 = scalar_select %p3130_p8, 1, 0 }
  0x1b   : > { %3835 = sst [smem:[#allocation21_spill]] %s3834_s24  ;;  %s337_s27 = sshll.u32 %s3013_s26, 4  ;;  %s3134_s27 = int_to_ptr.vmem [resolvable:$true] %s337_s27 }
  0x1c   : > { %p2444_p9 = pneg %p3130_p8  ;;  %s3014_s29 = smov [#allocation8]  }
  0x1d   : > { %s353_s30 = sshll.u32 %s3014_s29, 4  ;;  %s3015_s12 = smov [#allocation10]   ;;  %s3145_s30 = int_to_ptr.vmem [resolvable:$true] %s353_s30 }
  0x1e   : > { %p3141_p11 = pnand %p2444_p9, %p3815_p1  ;;  %s3147_s13 = sshll.u32 %s3015_s12, 4  ;;  %s367_s13 = int_to_ptr.vmem [resolvable:$true] %s3147_s13 }
  0x1f   : > { %s3838_s5 = sld [smem:[#allocation24_spill]] }
  0x20   : > { %p3157_p13 = pneg %p3141_p11 }
  0x25   : > { %s2757_s16 = scalar_lea.hbm %s3838_s5, 1024 }
  0x26   : > { %p2758_p12 = scmp.ne.s32.totalorder %s3838_s5, %s2757_s16  ;;  %p2764_p5 = scmp.lt.u32.totalorder %s2757_s16, %s3838_s5 }
  0x28   : > { %p2760_p0 = pnand %p3157_p13, %p2758_p12 }
  0x2a   : > { %p2761_p3 = pneg %p2760_p0 }
  0x2c   : > { %p2766_p7 = pnand %p2764_p5, %p2761_p3 }
  0x2e   : > { %2769 = shalt.err (!%p2766_p7)
}
  0x2f   : > { %s2770_s14 = scalar_lea.vmem %s3134_s27, 1024  ;;  %p2778_p2 = scmp.lt.s32.totalorder %s3134_s27, %s3134_s27 }
  0x30   : > { %p2771_p9 = scmp.ne.s32.totalorder %s3134_s27, %s2770_s14  ;;  %p2779_p6 = scmp.lt.s32.totalorder %s2770_s14, %s2770_s14 }
  0x32   : > { %p2773_p10 = pnand %p2771_p9, %p3157_p13  ;;  %p2780_p12 = por %p2779_p6, %p2778_p2 }
  0x34   : > { %p2774_p1 = pneg %p2773_p10 }
  0x36   : > { %p2781_p0 = pnand %p2780_p12, %p2774_p1 }
  0x38   : > { %2784 = shalt.err (!%p2781_p0)
}
  0x39   : > { %s3016_s15 = smov 64   ;;  %s3017_s16 = smov 4  }
  0x3a   : > { %2447 = dma.hbm_to_vmem [thread:$0]  (!%p3141_p11), %s3838_s5, 1024, %s3134_s27, [#allocation6], %s3016_s15, %s3016_s15, %s3017_s16  }
  0x3b   : > { %s3840_s7 = sld [smem:[#allocation25_spill]] }
  0x41   : > { %s2785_s17 = scalar_lea.hbm %s3840_s7, 512 }
  0x42   : > { %p2786_p2 = scmp.ne.s32.totalorder %s3840_s7, %s2785_s17  ;;  %p2792_p10 = scmp.lt.u32.totalorder %s2785_s17, %s3840_s7 }
  0x44   : > { %p2788_p1 = pnand %p2786_p2, %p3157_p13 }
  0x46   : > { %p2789_p6 = pneg %p2788_p1 }
  0x48   : > { %p2794_p3 = pnand %p2792_p10, %p2789_p6 }
  0x4a   : > { %2797 = shalt.err (!%p2794_p3)
}
  0x4b   : > { %s2798_s27 = scalar_lea.vmem %s3145_s30, 512  ;;  %p2806_p12 = scmp.lt.s32.totalorder %s3145_s30, %s3145_s30 }
  0x4c   : > { %p2799_p5 = scmp.ne.s32.totalorder %s3145_s30, %s2798_s27  ;;  %p2807_p0 = scmp.lt.s32.totalorder %s2798_s27, %s2798_s27 }
  0x4e   : > { %p2801_p7 = pnand %p2799_p5, %p3157_p13  ;;  %p2808_p2 = por %p2807_p0, %p2806_p12 }
  0x50   : > { %p2802_p9 = pneg %p2801_p7 }
  0x52   : > { %p2809_p1 = pnand %p2808_p2, %p2802_p9 }
  0x54   : > { %2812 = shalt.err (!%p2809_p1)
}
  0x55   : > { %2450 = dma.hbm_to_vmem [thread:$0]  (!%p3141_p11), %s3840_s7, 512, %s3145_s30, [#allocation9], %s3016_s15, %s3016_s15, %s3017_s16  }
  0x56   : > { %s3841_s8 = sld [smem:[#allocation26_spill]] }
  0x5c   : > { %s2813_s22 = scalar_lea.hbm %s3841_s8, 2048 }
  0x5d   : > { %p2814_p6 = scmp.ne.s32.totalorder %s3841_s8, %s2813_s22  ;;  %p2820_p5 = scmp.lt.u32.totalorder %s2813_s22, %s3841_s8 }
  0x5f   : > { %p2816_p10 = pnand %p2814_p6, %p3157_p13 }
  0x61   : > { %p2817_p3 = pneg %p2816_p10 }
  0x63   : > { %p2822_p7 = pnand %p2820_p5, %p2817_p3 }
  0x65   : > { %2825 = shalt.err (!%p2822_p7)
}
  0x66   : > { %s2826_s27 = scalar_lea.vmem %s367_s13, 2048  ;;  %p2834_p2 = scmp.lt.s32.totalorder %s367_s13, %s367_s13 }
  0x67   : > { %p2827_p9 = scmp.ne.s32.totalorder %s367_s13, %s2826_s27  ;;  %p2835_p1 = scmp.lt.s32.totalorder %s2826_s27, %s2826_s27 }
  0x69   : > { %p2829_p12 = pnand %p2827_p9, %p3157_p13  ;;  %p2836_p4 = por %p2835_p1, %p2834_p2 }
  0x6b   : > { %p2830_p0 = pneg %p2829_p12 }
  0x6d   : > { %p2837_p8 = pnand %p2836_p4, %p2830_p0 }
  0x6f   : > { %2840 = shalt.err (!%p2837_p8)
}
  0x70   : > { %s3821_s30 = smov 128   ;;  %s3823_s24 = smov 8  }
  0x71   : > { %2453 = dma.hbm_to_vmem [thread:$0]  (!%p3141_p11), %s3841_s8, 2048, %s367_s13, [#allocation9], %s3821_s30, %s3821_s30, %s3823_s24  }
  0x72   : > { %s3224_s9 = sadd.s32 1, %s3011_s20   ;;  %s94_s11 = sadd.s32 1, %s3007_s19 }
  0x73   : > { %s91_s10 = ssub.s32 %s3011_s20, %s3224_s9  ;;  %p101_p8 = scmp.ne.s32.totalorder %s3007_s19, %s3003_s18 }
  0x74   : > { %p92_p4 = scmp.eq.s32.totalorder %s91_s10, 0  ;;  %p102_p13 = scmp.eq.s32.totalorder %s3011_s20, 0 }
  0x75   : > { %p2471_p6 = scmp.lt.s32.totalorder %s3011_s20, 2  ;;  %p3843_p3 = scmp.eq.s32.totalorder %s3111_s21, 1 }
  0x76   : > { %s3234_s17 = scalar_select %p92_p4, %s3007_s19, %s94_s11  }
  0x77   : > { %p103_p10 = por %p102_p13, %p101_p8  ;;  %p3238_p5 = por %p3843_p3, %p101_p8 }
  0x78   : > { %3842 = sst [smem:[#allocation22_spill]] %s3234_s17  ;;  %s402_s22 = sand.u32 1, %s3007_s19  }
  0x79   : > { %s2254_s26 = sshll.u32 %s3011_s20, 11  ;;  %s3244_s13 = sshll.u32 %s402_s22, 7 }
  0x7a   : > { %s3845_s2 = sld [smem:[#allocation23_spill]]  ;;  %s406_s27 = scalar_lea.vmem [#allocation2], %s3244_s13 }
  0x7b   : > { %s413_s15 = sshll.u32 %s406_s27, 4  ;;  %p3252_p11 = pnand %p2471_p6, %p103_p10  ;;  %s3256_s15 = int_to_ptr.vmem [resolvable:$true] %s413_s15 }
  0x7c   : > { %s3261_s29 = scalar_lea.hbm %s3805_s3, %s2254_s26  ;;  %s3263_s12 = scalar_lea.sflag [#allocation3], %s402_s22 }
  0x7d   : > { %p2843_p9 = pneg %p3252_p11 }
  0x80   : > { %s3249_s14 = scalar_lea.hbm %s3845_s2, %s2254_s26  ;;  %s2846_s5 = scalar_lea.hbm %s3845_s2, 4096 }
  0x81   : > { %s2841_s30 = scalar_lea.hbm %s3249_s14, 2048  ;;  %p2847_p2 = scmp.lt.u32.totalorder %s3249_s14, %s3845_s2 }
  0x82   : > { %p2842_p7 = scmp.ne.s32.totalorder %s3249_s14, %s2841_s30  ;;  %p2848_p1 = scmp.lt.u32.totalorder %s2846_s5, %s2841_s30 }
  0x83   : > { %p2850_p8 = scmp.lt.u32.totalorder %s2841_s30, %s3249_s14 }
  0x84   : > { %p2844_p12 = pnand %p2843_p9, %p2842_p7  ;;  %p2849_p4 = por %p2848_p1, %p2847_p2 }
  0x86   : > { %p2845_p0 = pneg %p2844_p12  ;;  %p2851_p13 = por %p2850_p8, %p2849_p4 }
  0x88   : > { %p2852_p6 = pnand %p2851_p13, %p2845_p0 }
  0x8a   : > { %2855 = shalt.err (!%p2852_p6)
}
  0x8b   : > { %s2856_s22 = scalar_lea.vmem %s3256_s15, 2048  ;;  %s3020_s24 = smov [#allocation2]  }
  0x8c   : > { %p2857_p10 = scmp.ne.s32.totalorder %s3256_s15, %s2856_s22  ;;  %s2861_s26 = sshll.u32 %s3020_s24, 4  ;;  %s2862_s26 = int_to_ptr.vmem [resolvable:$false] %s2861_s26 }
  0x8d   : > { %s2863_s7 = scalar_lea.vmem %s2862_s26, 4096  ;;  %p2864_p12 = scmp.lt.s32.totalorder %s3256_s15, %s2862_s26 }
  0x8e   : > { %p2859_p3 = pnand %p2857_p10, %p2843_p9  ;;  %p2865_p2 = scmp.lt.s32.totalorder %s2863_s7, %s2856_s22 }
  0x90   : > { %p2860_p7 = pneg %p2859_p3  ;;  %p2866_p1 = por %p2865_p2, %p2864_p12 }
  0x92   : > { %p2867_p4 = pnand %p2866_p1, %p2860_p7 }
  0x94   : > { %2870 = shalt.err (!%p2867_p4)
}
  0x95   : > { %s3847_s5 = smov 8   ;;  %s3848_s8 = smov 128  }
  0x96   : > { %2457 = dma.hbm_to_vmem [thread:$0]  (!%p3252_p11), %s3249_s14, 2048, %s3256_s15, %s3263_s12, %s3848_s8, %s3848_s8, %s3847_s5  }
  0x97   : > { %s427_s30 = scalar_lea.vmem [#allocation5], %s3244_s13  ;;  %s423_s11 = sand.u32 1, %s3011_s20  }
  0x98   : > { %s434_s10 = sshll.u32 %s427_s30, 4  ;;  %s3298_s27 = scalar_lea.sflag [#allocation6], %s423_s11  ;;  %s3296_s10 = int_to_ptr.vmem [resolvable:$true] %s434_s10 }
  0x99   : > { %s2871_s22 = scalar_lea.hbm %s3261_s29, 2048  ;;  %s2876_s7 = scalar_lea.hbm %s3805_s3, 4096 }
  0x9a   : > { %p2872_p0 = scmp.ne.s32.totalorder %s3261_s29, %s2871_s22  ;;  %p2877_p6 = scmp.lt.u32.totalorder %s3261_s29, %s3805_s3 }
  0x9b   : > { %p2878_p10 = scmp.lt.u32.totalorder %s2876_s7, %s2871_s22  ;;  %p2880_p7 = scmp.lt.u32.totalorder %s2871_s22, %s3261_s29 }
  0x9c   : > { %p2874_p8 = pnand %p2872_p0, %p2843_p9 }
  0x9d   : > { %p2879_p3 = por %p2878_p10, %p2877_p6 }
  0x9e   : > { %p2875_p13 = pneg %p2874_p8 }
  0x9f   : > { %p2881_p12 = por %p2880_p7, %p2879_p3 }
  0xa1   : > { %p2882_p2 = pnand %p2881_p12, %p2875_p13 }
  0xa3   : > { %2885 = shalt.err (!%p2882_p2)
}
  0xa4   : > { %s2886_s13 = scalar_lea.vmem %s3296_s10, 2048  ;;  %s3021_s14 = smov [#allocation5]  }
  0xa5   : > { %p2887_p1 = scmp.ne.s32.totalorder %s3296_s10, %s2886_s13  ;;  %s2891_s15 = sshll.u32 %s3021_s14, 4  ;;  %s2892_s15 = int_to_ptr.vmem [resolvable:$false] %s2891_s15 }
  0xa6   : > { %s2893_s2 = scalar_lea.vmem %s2892_s15, 4096  ;;  %p2894_p8 = scmp.lt.s32.totalorder %s3296_s10, %s2892_s15 }
  0xa7   : > { %p2889_p4 = pnand %p2887_p1, %p2843_p9  ;;  %p2895_p6 = scmp.lt.s32.totalorder %s2893_s2, %s2886_s13 }
  0xa9   : > { %p2890_p0 = pneg %p2889_p4  ;;  %p2896_p10 = por %p2895_p6, %p2894_p8 }
  0xab   : > { %p2897_p3 = pnand %p2896_p10, %p2890_p0 }
  0xad   : > { %2900 = shalt.err (!%p2897_p3)
}
  0xae   : > { %2460 = dma.hbm_to_vmem [thread:$0]  (!%p3252_p11), %s3261_s29, 2048, %s3296_s10, %s3298_s27, %s3848_s8, %s3848_s8, %s3847_s5  }
  0xaf   : > { %p3849_p9 = scmp.ne.s32.totalorder %s3836_s25, 0 }
  0xb0   : > { %s3330_s17 = sand.u32 (!%p3849_p9), 1, %s3003_s18   ;;  %p3850_p13 = scmp.ne.s32.totalorder (!%p3849_p9), %s3833_s23, 0 }
  0xb1   : > { %446 = sbr.rel (%p3849_p9) target bundleno = 1353 (0x549), region = 60  ;;  %s3333_s12 = sshll.u32 (!%p3849_p9), %s3330_s17, 7 }
  0xb2   : > { %s449_s16 = scalar_lea.sflag (!%p3849_p9), [#allocation3], %s3330_s17  ;;  %s3337_s30 = scalar_lea.vmem (!%p3849_p9), [#allocation2], %s3333_s12 }
  0xb8   : > { %2974 = dma.done.wait (%p3850_p13), %s449_s16, 2048  }
  0xb9   : > { %2976 = vsyncadd (%p3850_p13), %s449_s16, 4294965248  ;;  %s457_s25 = sand.u32 1, %s3111_s21   ;;  %s3345_s5 = scalar_lea.vmem [#allocation5], %s3333_s12 }
  0xba   : > { %s458_s29 = scalar_lea.sflag [#allocation6], %s457_s25 }
  0xbb   : > { %2978 = dma.done.wait (%p3850_p13), %s458_s29, 2048  }
  0xbc   : > { %2980 = vsyncadd (%p3850_p13), %s458_s29, 4294965248  ;;  %p3851_p11 = scmp.eq.s32.totalorder %s3111_s21, 0 }
  0xbe   : > { %2982 = dma.done.wait (%p3851_p11), [#allocation6], 1024   ;;  %p3852_p7 = pmov %p3851_p11 }
  0xc0   : > { %2984 = vsyncadd (%p3852_p7), [#allocation6], 4294966272  ;;  %p3853_p12 = pmov %p3852_p7 }
  0xc1   : > { %p3854_p2 = pmov %p3852_p7 }
  0xc2   : > { %2986 = dma.done.wait (%p3853_p12), [#allocation9], 2560  }
  0xc3   : > { %2988 = vsyncadd (%p3854_p2), [#allocation9], 4294964736  ;;  %v2521_v0 = vld [vmem:[%s3806_s4 + $0x40] sm:$0xff]   ;;  %s2139_s11 = sshll.u32 %s3111_s21, 4  ;;  %v2523_v2 = vld [vmem:[%s3806_s4 + $0x48] sm:$0xff]   ;;  %s3466_s13 = scalar_lea.vmem [#allocation12], %s3333_s12 }
  0xc4   : > { %v2522_v1 = vld [vmem:[%s3806_s4] sm:$0xff]   ;;  %2260 = vmatprep.subr.bf16.mxu0 %v2521_v0  ;;  %2408 = vmatprep.subr.bf16.mxu1 %v2521_v0  ;;  %v2524_v3 = vld [vmem:[%s3806_s4 + $0x8] sm:$0xff]   ;;  %p534_p1 = scmp.lt.s32.totalorder %s2139_s11, 31  ;;  %v2525_v4 = vld [vmem:[%s3806_s4 + $0x50] sm:$0xff]   ;;  %s3022_s12 = smov 64   ;;  %vm1296_vm0 = vcmask 523264  }
  0xc5   : > { %2261 = vmatpush3.bf16.msra.mxu0 %v2522_v1  ;;  %2416 = vmatpush3.bf16.msra.mxu1 %v2522_v1  ;;  %v2526_v5 = vld [vmem:[%s3806_s4 + $0x10] sm:$0xff]   ;;  %v2527_v6 = vld [vmem:[%s3806_s4 + $0x58] sm:$0xff]   ;;  %v2529_v8 = vld [vmem:[%s3806_s4 + $0x60] sm:$0xff]   ;;  %s3855_s25 = sld [smem:[#allocation29_spill]]  ;;  %s1909_s8 = scalar_lea.sflag [#allocation13], %s3330_s17 }
  0xc6   : > { %2262 = vmatprep.subr.bf16.mxu0 %v2523_v2  ;;  %2409 = vmatprep.subr.bf16.mxu1 %v2523_v2  ;;  %s3868_s11 = smov (!%p534_p1, %s2139_s11), 31  ;;  %v2528_v7 = vld [vmem:[%s3806_s4 + $0x18] sm:$0xff]   ;;  %v2530_v9 = vld [vmem:[%s3806_s4 + $0x20] sm:$0xff]   ;;  %v2531_v10 = vld [vmem:[%s3806_s4 + $0x68] sm:$0xff]   ;;  %s3024_s27 = smov [#allocation12]  }
  0xc7   : > { %s2256_s10 = sshll.u32 %s3868_s11, 3  ;;  %v2532_v12 = vld [vmem:[%s3806_s4 + $0x28] sm:$0xff]   ;;  %v2533_v13 = vld [vmem:[%s3806_s4 + $0x70] sm:$0xff]   ;;  %v2535_v16 = vld [vmem:[%s3806_s4 + $0x78] sm:$0xff]   ;;  %s1939_s11 = sshll.u32 %s3466_s13, 4  ;;  %s3651_s11 = int_to_ptr.vmem [resolvable:$true] %s1939_s11 }
  0xc8   : > { %s3395_s26 = scalar_lea.vmem %s3802_s0, %s2256_s10  ;;  %v2534_v15 = vld [vmem:[%s3806_s4 + $0x30] sm:$0xff]   ;;  %v2536_v17 = vld [vmem:[%s3806_s4 + $0x38] sm:$0xff]   ;;  %v2561_v21 = vld [vmem:[#allocation7] sm:$0xff]   ;;  %s3578_s2 = scalar_lea.vmem %s3803_s1, %s2256_s10 }
  0xc9   : > { %2263 = vmatpush3.bf16.msra.mxu0 %v2524_v3  ;;  %2417 = vmatpush3.bf16.msra.mxu1 %v2524_v3  ;;  %v2539_v11 = vld [vmem:[%s3395_s26 + $0x4] ss:$8 sps:$4 sm:$0xff]   ;;  %v2537_v18 = vld [vmem:[%s3395_s26] ss:$8 sps:$4 sm:$0xff]   ;;  %v2540_v19 = vld [vmem:[%s3395_s26 + $0x14] ss:$8 sps:$4 sm:$0xff]  }
  0xca   : > { %2264 = vmatprep.subr.bf16.mxu0 %v2525_v4  ;;  %2410 = vmatprep.subr.bf16.mxu1 %v2525_v4  ;;  %v2547_v14 = vld [vmem:[%s3395_s26 + $0x44] ss:$8 sps:$4 sm:$0xff]   ;;  %v2545_v20 = vld [vmem:[%s3395_s26 + $0x40] ss:$8 sps:$4 sm:$0xff]   ;;  %v2551_v22 = vld [vmem:[%s3395_s26 + $0x54] ss:$8 sps:$4 sm:$0xff]  }
  0xcb   : > { %839 = vmatprep.mubr.bf16.mxu0 %v2539_v11  ;;  %871 = vmatprep.mubr.bf16.mxu1 %v2547_v14  ;;  %v2562_v23 = vld [vmem:[#allocation7 + $0x8] sm:$0xff]   ;;  %v2563_v24 = vld [vmem:[#allocation7 + $0x10] sm:$0xff]   ;;  %v2564_v35 = vld [vmem:[#allocation7 + $0x18] sm:$0xff]   ;;  %s2901_s23 = scalar_lea.vmem %s3651_s11, 2048  ;;  %s2905_s22 = sshll.u32 %s3024_s27, 4  ;;  %s2906_s22 = int_to_ptr.vmem [resolvable:$false] %s2905_s22 }
  0xcc   : > { %v2542_v25 = vld [vmem:[%s3395_s26 + $0x10] ss:$8 sps:$4 sm:$0xff]   ;;  %v2543_v26 = vld [vmem:[%s3395_s26 + $0x24] ss:$8 sps:$4 sm:$0xff]   ;;  %v2548_v29 = vld [vmem:[%s3395_s26 + $0x20] ss:$8 sps:$4 sm:$0xff]   ;;  %p2902_p4 = scmp.ne.s32.totalorder %s3651_s11, %s2901_s23  ;;  %p2908_p6 = scmp.lt.s32.totalorder %s3651_s11, %s2906_s22 }
  0xcd   : > { %2265 = vmatpush3.bf16.msra.mxu0 %v2526_v5  ;;  %2418 = vmatpush3.bf16.msra.mxu1 %v2526_v5  ;;  %v2554_v27 = vld [vmem:[%s3395_s26 + $0x50] ss:$8 sps:$4 sm:$0xff]   ;;  %v2555_v28 = vld [vmem:[%s3395_s26 + $0x64] ss:$8 sps:$4 sm:$0xff]   ;;  %v2549_v30 = vld [vmem:[%s3395_s26 + $0x34] ss:$8 sps:$4 sm:$0xff]  }
  0xce   : > { %2266 = vmatprep.subr.bf16.mxu0 %v2527_v6  ;;  %2411 = vmatprep.subr.bf16.mxu1 %v2527_v6  ;;  %v2557_v31 = vld [vmem:[%s3395_s26 + $0x60] ss:$8 sps:$4 sm:$0xff]   ;;  %v2558_v32 = vld [vmem:[%s3395_s26 + $0x74] ss:$8 sps:$4 sm:$0xff]   ;;  %v2553_v33 = vld [vmem:[%s3395_s26 + $0x30] ss:$8 sps:$4 sm:$0xff]   ;;  %p2903_p0 = pnand %p2902_p4, %p3238_p5 }
  0xcf   : > { %v2560_v34 = vld [vmem:[%s3395_s26 + $0x70] ss:$8 sps:$4 sm:$0xff]   ;;  %v2565_v36 = vld [vmem:[#allocation7 + $0x20] sm:$0xff]   ;;  %v2566_v37 = vld [vmem:[#allocation7 + $0x28] sm:$0xff]   ;;  %s2907_s24 = scalar_lea.vmem %s2906_s22, 4096 }
  0xd0   : > { %v2567_v38 = vld [vmem:[#allocation7 + $0x30] sm:$0xff]   ;;  %v2568_v39 = vld [vmem:[#allocation7 + $0x38] sm:$0xff]   ;;  %v615_v41 = vld [vmem:[%s3337_s30] sm:$0xff]  ;;  %p2904_p8 = pneg %p2903_p0  ;;  %p2909_p10 = scmp.lt.s32.totalorder %s2907_s24, %s2901_s23 }
  0xd1   : > { %2267 = vmatpush3.bf16.msra.mxu0 %v2528_v7  ;;  %2419 = vmatpush3.bf16.msra.mxu1 %v2528_v7  ;;  %v623_v46 = vld [vmem:[%s3337_s30 + $0x40] sm:$0xff]  ;;  %v616_v48 = vld [vmem:[%s3337_s30 + $0x8] sm:$0xff]  ;;  %v617_v0 = vld [vmem:[%s3337_s30 + $0x10] sm:$0xff] }
  0xd2   : > { %2268 = vmatprep.subr.bf16.mxu0 %v2529_v8  ;;  %2412 = vmatprep.subr.bf16.mxu1 %v2529_v8  ;;  %v624_v54 = vld [vmem:[%s3337_s30 + $0x48] sm:$0xff]  ;;  %v625_v7 = vld [vmem:[%s3337_s30 + $0x50] sm:$0xff]  ;;  %p2910_p3 = por %p2909_p10, %p2908_p6 }
  0xd4   : > { %p2911_p9 = pnand %p2910_p3, %p2904_p8 }
  0xd5   : > { %2269 = vmatpush3.bf16.msra.mxu0 %v2530_v9  ;;  %2420 = vmatpush3.bf16.msra.mxu1 %v2530_v9  ;;  %v618_v9 = vld [vmem:[%s3337_s30 + $0x18] sm:$0xff] }
  0xd6   : > { %2270 = vmatprep.subr.bf16.mxu0 %v2531_v10  ;;  %2413 = vmatprep.subr.bf16.mxu1 %v2531_v10 }
  0xd9   : > { %2271 = vmatpush3.bf16.msra.mxu0 %v2532_v12  ;;  %2421 = vmatpush3.bf16.msra.mxu1 %v2532_v12 }
  0xda   : > { %2272 = vmatprep.subr.bf16.mxu0 %v2533_v13  ;;  %2414 = vmatprep.subr.bf16.mxu1 %v2533_v13 }
  0xdd   : > { %2273 = vmatpush3.bf16.msra.mxu0 %v2534_v15  ;;  %2422 = vmatpush3.bf16.msra.mxu1 %v2534_v15 }
  0xde   : > { %2274 = vmatprep.subr.bf16.mxu0 %v2535_v16  ;;  %2415 = vmatprep.subr.bf16.mxu1 %v2535_v16  ;;  %v626_v16 = vld [vmem:[%s3337_s30 + $0x58] sm:$0xff] }
  0xe1   : > { %2275 = vmatpush3.bf16.msra.mxu0 %v2536_v17  ;;  %2423 = vmatpush3.bf16.msra.mxu1 %v2536_v17 }
  0xe2   : > { %2352 = vmatprep.subr.bf16.mxu1 %v2561_v21 }
  0xe4   : > { %840 = vmatmul.mubr.bf16.vlgmr.msra.gmra.mrb[0].mxu0 %v2537_v18  ;;  %872 = vmatmul.mubr.bf16.vlgmr.msra.gmra.mrb[0].mxu1 %v2545_v20 }
  0xe5   : > { %847 = vmatprep.mubr.bf16.mxu0 %v2540_v19  ;;  %879 = vmatprep.mubr.bf16.mxu1 %v2551_v22 }
  0xe6   : > { %2353 = vmatpush3.bf16.msra.mxu1 %v2561_v21 }
  0xe7   : > { %2354 = vmatprep.subr.bf16.mxu1 %v2562_v23 }
  0xea   : > { %2355 = vmatpush3.bf16.msra.mxu1 %v2562_v23 }
  0xeb   : > { %2356 = vmatprep.subr.bf16.mxu1 %v2563_v24 }
  0xec   : > { %848 = vmatmul.mubr.bf16.gmra.mrb[4].mxu0 %v2542_v25  ;;  %880 = vmatmul.mubr.bf16.gmra.mrb[4].mxu1 %v2554_v27 }
  0xed   : > { %855 = vmatprep.mubr.bf16.mxu0 %v2543_v26  ;;  %887 = vmatprep.mubr.bf16.mxu1 %v2555_v28  ;;  %v619_v26 = vld [vmem:[%s3337_s30 + $0x20] sm:$0xff] }
  0xee   : > { %2357 = vmatpush3.bf16.msra.mxu1 %v2563_v24 }
  0xef   : > { %2358 = vmatprep.subr.bf16.mxu1 %v2564_v35 }
  0xf2   : > { %2359 = vmatpush3.bf16.msra.mxu1 %v2564_v35  ;;  %v620_v35 = vld [vmem:[%s3337_s30 + $0x28] sm:$0xff] }
  0xf3   : > { %2360 = vmatprep.subr.bf16.mxu1 %v2565_v36 }
  0xf4   : > { %856 = vmatmul.mubr.bf16.gmra.mrb[8].mxu0 %v2548_v29  ;;  %888 = vmatmul.mubr.bf16.gmra.mrb[8].mxu1 %v2557_v31 }
  0xf5   : > { %863 = vmatprep.mubr.bf16.mxu0 %v2549_v30  ;;  %895 = vmatprep.mubr.bf16.mxu1 %v2558_v32 }
  0xf6   : > { %2361 = vmatpush3.bf16.msra.mxu1 %v2565_v36 }
  0xf7   : > { %2362 = vmatprep.subr.bf16.mxu1 %v2566_v37 }
  0xfa   : > { %2363 = vmatpush3.bf16.msra.mxu1 %v2566_v37 }
  0xfb   : > { %2364 = vmatprep.subr.bf16.mxu1 %v2567_v38 }
  0xfc   : > { %864 = vmatmul.mubr.bf16.gmra.mrb[12].mxu0 %v2553_v33  ;;  %896 = vmatmul.mubr.bf16.gmra.mrb[12].mxu1 %v2560_v34  ;;  %v627_v33 = vld [vmem:[%s3337_s30 + $0x60] sm:$0xff] }
  0xfe   : > { %2365 = vmatpush3.bf16.msra.mxu1 %v2567_v38 }
  0xff   : > { %2366 = vmatprep.subr.bf16.mxu1 %v2568_v39 }
 0x102   : > { %2367 = vmatpush3.bf16.msra.mxu1 %v2568_v39 }
 0x1b7   : > { %v2276_v40 = vpop.f32.mrb[0].mxu0  ;;  %v2300_v43 = vpop.f32.mrb[0].mxu1 }
 0x1b8   : > { %v2277_v42 = vpop.f32.mrb[1].mxu0  ;;  %v2301_v47 = vpop.f32.mrb[1].mxu1 }
 0x1b9   : > { %v2278_v44 = vadd.f32 %v2277_v42, %v2276_v40  ;;  %v2279_v45 = vpop.f32.mrb[2].mxu0  ;;  %v2302_v50 = vadd.f32 %v2301_v47, %v2300_v43  ;;  %v2303_v51 = vpop.f32.mrb[2].mxu1  ;;  %v628_v42 = vld [vmem:[%s3337_s30 + $0x68] sm:$0xff] }
 0x1ba   : > { %v2280_v49 = vpop.f32.mrb[3].mxu0  ;;  %v2304_v55 = vpop.f32.mrb[3].mxu1 }
 0x1bb   : > { %v842_v52 = vadd.f32 %v2278_v44, %v615_v41  ;;  %v2281_v53 = vadd.f32 %v2280_v49, %v2279_v45  ;;  %v874_v56 = vadd.f32 %v2302_v50, %v623_v46  ;;  %v2305_v57 = vadd.f32 %v2304_v55, %v2303_v51 }
 0x1bd   : > { %v845_v58 = vadd.f32 %v2281_v53, %v616_v48  ;;  %v912_v59 = vmax.f32 %v874_v56, 0.0  ;;  %v877_v60 = vadd.f32 %v2305_v57, %v624_v54  ;;  %v904_v61 = vmax.f32 %v842_v52, 0.0  ;;  %v621_v52 = vld [vmem:[%s3337_s30 + $0x30] sm:$0xff] }
 0x1bf   : > { %v905_v62 = vmax.f32 %v845_v58, 0.0  ;;  %v2282_v63 = vpop.f32.mrb[4].mxu0  ;;  %v913_v2 = vmax.f32 %v877_v60, 0.0  ;;  %v2306_v3 = vpop.f32.mrb[4].mxu1 }
 0x1c0   : > { %v2283_v1 = vpop.f32.mrb[5].mxu0  ;;  %v2307_v8 = vpop.f32.mrb[5].mxu1 }
 0x1c1   : > { %v2284_v4 = vadd.f32 %v2283_v1, %v2282_v63  ;;  %v2285_v5 = vpop.f32.mrb[6].mxu0  ;;  %v920_v6 = vpack.c.bf16 %v905_v62, %v904_v61  ;;  %v2308_v11 = vadd.f32 %v2307_v8, %v2306_v3  ;;  %v2309_v12 = vpop.f32.mrb[6].mxu1  ;;  %v3441_v13 = vpack.c.bf16 %v913_v2, %v912_v59  ;;  %v629_v59 = vld [vmem:[%s3337_s30 + $0x70] sm:$0xff]  ;;  %v622_v61 = vld [vmem:[%s3337_s30 + $0x38] sm:$0xff] }
 0x1c2   : > { %v2286_v10 = vpop.f32.mrb[7].mxu0  ;;  %v2310_v17 = vpop.f32.mrb[7].mxu1 }
 0x1c3   : > { %v850_v14 = vadd.f32 %v2284_v4, %v617_v0  ;;  %v2287_v15 = vadd.f32 %v2286_v10, %v2285_v5  ;;  %2368 = vmatprep.mubr.bf16.mxu1 %v920_v6  ;;  %v882_v18 = vadd.f32 %v2308_v11, %v625_v7  ;;  %v2311_v19 = vadd.f32 %v2310_v17, %v2309_v12  ;;  %v630_v4 = vld [vmem:[%s3337_s30 + $0x78] sm:$0xff]  ;;  %v2569_v17 = vld [vmem:[#allocation8] sm:$0xff]  }
 0x1c4   : > { %2384 = vmatprep.subr.bf16.mxu1 %v2569_v17 }
 0x1c5   : > { %v853_v20 = vadd.f32 %v2287_v15, %v618_v9  ;;  %v914_v21 = vmax.f32 %v882_v18, 0.0  ;;  %v885_v22 = vadd.f32 %v2311_v19, %v626_v16  ;;  %v906_v23 = vmax.f32 %v850_v14, 0.0  ;;  %v2570_v18 = vld [vmem:[#allocation8 + $0x8] sm:$0xff]   ;;  %v2571_v19 = vld [vmem:[#allocation8 + $0x10] sm:$0xff]  }
 0x1c7   : > { %v907_v24 = vmax.f32 %v853_v20, 0.0  ;;  %v2288_v25 = vpop.f32.mrb[8].mxu0  ;;  %v915_v28 = vmax.f32 %v885_v22, 0.0  ;;  %v2312_v29 = vpop.f32.mrb[8].mxu1  ;;  %v3456_v20 = vld [vmem:[%s3808_s6] ss:$0 sm:$0xff] }
 0x1c8   : > { %v2289_v27 = vpop.f32.mrb[9].mxu0  ;;  %v2313_v34 = vpop.f32.mrb[9].mxu1 }
 0x1c9   : > { %v921_v30 = vpack.c.bf16 %v907_v24, %v906_v23  ;;  %v2290_v31 = vadd.f32 %v2289_v27, %v2288_v25  ;;  %v2291_v32 = vpop.f32.mrb[10].mxu0  ;;  %v2314_v37 = vadd.f32 %v2313_v34, %v2312_v29  ;;  %v2315_v38 = vpop.f32.mrb[10].mxu1  ;;  %v925_v39 = vpack.c.bf16 %v915_v28, %v914_v21 }
 0x1ca   : > { %v2292_v36 = vpop.f32.mrb[11].mxu0  ;;  %v2316_v43 = vpop.f32.mrb[11].mxu1 }
 0x1cb   : > { %v858_v40 = vadd.f32 %v2290_v31, %v619_v26  ;;  %v2293_v41 = vadd.f32 %v2292_v36, %v2291_v32  ;;  %2369 = vmatmul.mubr.bf16.vlgmr.msra.gmra.mrb[16].mxu1 %v921_v30  ;;  %v890_v44 = vadd.f32 %v2314_v37, %v627_v33  ;;  %v2317_v45 = vadd.f32 %v2316_v43, %v2315_v38  ;;  %v2572_v36 = vld [vmem:[#allocation8 + $0x18] sm:$0xff]  }
 0x1cc   : > { %2385 = vmatpush3.bf16.msra.mxu1 %v2569_v17 }
 0x1cd   : > { %v861_v46 = vadd.f32 %v2293_v41, %v620_v35  ;;  %v916_v47 = vmax.f32 %v890_v44, 0.0  ;;  %v893_v48 = vadd.f32 %v2317_v45, %v628_v42  ;;  %v908_v49 = vmax.f32 %v858_v40, 0.0  ;;  %2386 = vmatprep.subr.bf16.mxu1 %v2570_v18 }
 0x1cf   : > { %v909_v50 = vmax.f32 %v861_v46, 0.0  ;;  %v2294_v51 = vpop.f32.mrb[12].mxu0  ;;  %v917_v54 = vmax.f32 %v893_v48, 0.0  ;;  %v2318_v55 = vpop.f32.mrb[12].mxu1 }
 0x1d0   : > { %v2295_v53 = vpop.f32.mrb[13].mxu0  ;;  %v2319_v60 = vpop.f32.mrb[13].mxu1  ;;  %2387 = vmatpush3.bf16.msra.mxu1 %v2570_v18 }
 0x1d1   : > { %v2296_v56 = vadd.f32 %v2295_v53, %v2294_v51  ;;  %v2297_v57 = vpop.f32.mrb[14].mxu0  ;;  %v922_v58 = vpack.c.bf16 %v909_v50, %v908_v49  ;;  %v2320_v63 = vadd.f32 %v2319_v60, %v2318_v55  ;;  %v2321_v0 = vpop.f32.mrb[14].mxu1  ;;  %v926_v1 = vpack.c.bf16 %v917_v54, %v916_v47  ;;  %2388 = vmatprep.subr.bf16.mxu1 %v2571_v19 }
 0x1d2   : > { %v2298_v62 = vpop.f32.mrb[15].mxu0  ;;  %v2322_v5 = vpop.f32.mrb[15].mxu1 }
 0x1d3   : > { %v866_v2 = vadd.f32 %v2296_v56, %v621_v52  ;;  %v2299_v3 = vadd.f32 %v2298_v62, %v2297_v57  ;;  %2372 = vmatprep.mubr.bf16.mxu1 %v922_v58  ;;  %v898_v6 = vadd.f32 %v2320_v63, %v629_v59  ;;  %v2323_v7 = vadd.f32 %v2322_v5, %v2321_v0 }
 0x1d4   : > { %2389 = vmatpush3.bf16.msra.mxu1 %v2571_v19 }
 0x1d5   : > { %v869_v8 = vadd.f32 %v2299_v3, %v622_v61  ;;  %v918_v9 = vmax.f32 %v898_v6, 0.0  ;;  %v901_v10 = vadd.f32 %v2323_v7, %v630_v4  ;;  %v910_v11 = vmax.f32 %v866_v2, 0.0  ;;  %2390 = vmatprep.subr.bf16.mxu1 %v2572_v36 }
 0x1d7   : > { %v911_v12 = vmax.f32 %v869_v8, 0.0  ;;  %v919_v14 = vmax.f32 %v901_v10, 0.0 }
 0x1d8   : > { %2391 = vmatpush3.bf16.msra.mxu1 %v2572_v36 }
 0x1d9   : > { %v923_v15 = vpack.c.bf16 %v911_v12, %v910_v11  ;;  %v927_v16 = vpack.c.bf16 %v919_v14, %v918_v9 }
 0x1db   : > { %2373 = vmatmul.mubr.bf16.gmra.mrb[20].mxu1 %v923_v15 }
 0x1dc   : > { %2376 = vmatprep.mubr.bf16.mxu1 %v3441_v13 }
 0x1e3   : > { %2377 = vmatmul.mubr.bf16.gmra.mrb[24].mxu1 %v925_v39 }
 0x1e4   : > { %2380 = vmatprep.mubr.bf16.mxu1 %v926_v1 }
 0x1eb   : > { %2381 = vmatmul.mubr.bf16.gmra.mrb[28].mxu1 %v927_v16 }
 0x29e   : > { %v2370_v21 = vpop.f32.mrb[16].mxu1 }
 0x29f   : > { %v3459_v13 = vadd.f32 %v2370_v21, %v3456_v20  ;;  %v1033_v22 = vpop.f32.mrb[17].mxu1 }
 0x2a0   : > { %v3462_v23 = vadd.f32 %v3456_v20, %v1033_v22  ;;  %v2371_v24 = vpop.f32.mrb[18].mxu1 }
 0x2a1   : > { %v1098_v25 = vmul.f32 0.5, %v3459_v13  ;;  %1889 = vst [vmem:[%s3466_s13 + $0x10] sm:$0xff] %v3459_v13  ;;  %v3471_v26 = vadd.f32 %v2371_v24, %v3456_v20  ;;  %v1036_v27 = vpop.f32.mrb[19].mxu1 }
 0x2a2   : > { %v1096_v28 = vmul.f32 0.5, %v3462_v23  ;;  %1887 = vst [vmem:[%s3466_s13] sm:$0xff] %v3462_v23  ;;  %v3477_v29 = vadd.f32 %v3456_v20, %v1036_v27 }
 0x2a3   : > { %v1116_v30 = vmul.f32 1.442695, %v1098_v25  ;;  %v1099_v31 = vmul.f32 0.5, %v3471_v26  ;;  %1890 = vst [vmem:[%s3466_s13 + $0x18] sm:$0xff] %v3471_v26 }
 0x2a4   : > { %v1112_v32 = vmul.f32 1.442695, %v1096_v28  ;;  %v1097_v33 = vmul.f32 0.5, %v3477_v29  ;;  %1888 = vst [vmem:[%s3466_s13 + $0x8] sm:$0xff] %v3477_v29 }
 0x2a5   : > { %2597 = vpow2.f32 %v1116_v30  ;;  %v1118_v34 = vmul.f32 1.442695, %v1099_v31 }
 0x2a6   : > { %2599 = vpow2.f32 %v1112_v32  ;;  %v1114_v35 = vmul.f32 1.442695, %v1097_v33 }
 0x2a7   : > { %2601 = vpow2.f32 %v1118_v34 }
 0x2a8   : > { %2603 = vpow2.f32 %v1114_v35 }
 0x2ae   : > { %v2374_v37 = vpop.f32.mrb[20].mxu1 }
 0x2af   : > { %v2598_v38 = vpop.eup %2597  ;;  %v3486_v39 = vadd.f32 %v2374_v37, %v3456_v20  ;;  %v1049_v40 = vpop.f32.mrb[21].mxu1 }
 0x2b0   : > { %v2600_v41 = vpop.eup %2599  ;;  %v3489_v42 = vadd.f32 %v3456_v20, %v1049_v40  ;;  %1164 = vrot.lane.b32.xlu1 %v2598_v38, %s3022_s12  ;;  %v2375_v43 = vpop.f32.mrb[22].mxu1  ;;  %v2573_v38 = vld [vmem:[#allocation10] ss:$8 sps:$4 sm:$0xff]   ;;  %v2575_v40 = vld [vmem:[#allocation10 + $0x4] ss:$8 sps:$4 sm:$0xff]  }
 0x2b1   : > { %1893 = vst [vmem:[%s3466_s13 + $0x30] sm:$0xff] %v3486_v39  ;;  %v3495_v44 = vadd.f32 %v2375_v43, %v3456_v20  ;;  %v1052_v45 = vpop.f32.mrb[23].mxu1  ;;  %1160 = vrot.lane.b32.xlu0 %v2600_v41, %s3022_s12  ;;  %v1102_v46 = vmul.f32 0.5, %v3486_v39  ;;  %v2602_v49 = vpop.eup %2601  ;;  %v2578_v43 = vld [vmem:[#allocation10 + $0x14] ss:$8 sps:$4 sm:$0xff]   ;;  %1550 = vmatprep.subr.bf16.mxu0 %v2575_v40 }
 0x2b2   : > { %v1100_v47 = vmul.f32 0.5, %v3489_v42  ;;  %1891 = vst [vmem:[%s3466_s13 + $0x20] sm:$0xff] %v3489_v42  ;;  %v3503_v48 = vadd.f32 %v3456_v20, %v1052_v45  ;;  %v2604_v50 = vpop.eup %2603  ;;  %1551 = vmatpush1.bf16.msra.mxu0 %v2573_v38 }
 0x2b3   : > { %1894 = vst [vmem:[%s3466_s13 + $0x38] sm:$0xff] %v3495_v44  ;;  %v1103_v52 = vmul.f32 0.5, %v3495_v44  ;;  %v1124_v54 = vmul.f32 1.442695, %v1102_v46  ;;  %v2576_v46 = vld [vmem:[#allocation10 + $0x10] ss:$8 sps:$4 sm:$0xff]   ;;  %1552 = vmatprep.subr.bf16.mxu0 %v2578_v43 }
 0x2b4   : > { %v1120_v51 = vmul.f32 1.442695, %v1100_v47  ;;  %v1101_v53 = vmul.f32 0.5, %v3503_v48  ;;  %1892 = vst [vmem:[%s3466_s13 + $0x28] sm:$0xff] %v3503_v48  ;;  %1166 = vrot.lane.b32.xlu1 %v2602_v49, %s3022_s12  ;;  %v2581_v49 = vld [vmem:[#allocation10 + $0x24] ss:$8 sps:$4 sm:$0xff]  }
 0x2b5   : > { %1162 = vrot.lane.b32.xlu0 %v2604_v50, %s3022_s12  ;;  %v1126_v59 = vmul.f32 1.442695, %v1103_v52  ;;  %v2579_v50 = vld [vmem:[#allocation10 + $0x20] ss:$8 sps:$4 sm:$0xff]   ;;  %v2582_v52 = vld [vmem:[#allocation10 + $0x30] ss:$8 sps:$4 sm:$0xff]  }
 0x2b6   : > { %2605 = vpow2.f32 %v1120_v51  ;;  %v1122_v55 = vmul.f32 1.442695, %v1101_v53  ;;  %v2378_v56 = vpop.f32.mrb[24].mxu1  ;;  %1553 = vmatpush1.bf16.msra.mxu0 %v2576_v46  ;;  %v2584_v51 = vld [vmem:[#allocation10 + $0x34] ss:$8 sps:$4 sm:$0xff]  }
 0x2b7   : > { %v3514_v57 = vadd.f32 %v2378_v56, %v3456_v20  ;;  %v1065_v58 = vpop.f32.mrb[25].mxu1  ;;  %1554 = vmatprep.subr.bf16.mxu0 %v2581_v49  ;;  %v2587_v53 = vld [vmem:[#allocation10 + $0x44] ss:$8 sps:$4 sm:$0xff]   ;;  %v2588_v56 = vld [vmem:[#allocation10 + $0x50] ss:$8 sps:$4 sm:$0xff]  }
 0x2b8   : > { %2607 = vpow2.f32 %v1122_v55  ;;  %v3517_v60 = vadd.f32 %v3456_v20, %v1065_v58  ;;  %v2379_v61 = vpop.f32.mrb[26].mxu1  ;;  %v2590_v55 = vld [vmem:[#allocation10 + $0x54] ss:$8 sps:$4 sm:$0xff]  }
 0x2b9   : > { %v1106_v62 = vmul.f32 0.5, %v3514_v57  ;;  %1897 = vst [vmem:[%s3466_s13 + $0x50] sm:$0xff] %v3514_v57  ;;  %v3523_v63 = vadd.f32 %v2379_v61, %v3456_v20  ;;  %v1068_v0 = vpop.f32.mrb[27].mxu1  ;;  %2609 = vpow2.f32 %v1124_v54  ;;  %v2585_v54 = vld [vmem:[#allocation10 + $0x40] ss:$8 sps:$4 sm:$0xff]   ;;  %v578_v46 = vld [vmem:[%s3578_s2 + $0x58] sm:$0xff] }
 0x2ba   : > { %v1104_v1 = vmul.f32 0.5, %v3517_v60  ;;  %1895 = vst [vmem:[%s3466_s13 + $0x40] sm:$0xff] %v3517_v60  ;;  %v3529_v2 = vadd.f32 %v3456_v20, %v1068_v0  ;;  %2611 = vpow2.f32 %v1126_v59  ;;  %1555 = vmatpush1.bf16.msra.mxu0 %v2579_v50  ;;  %v567_v59 = vld [vmem:[%s3578_s2] sm:$0xff]  ;;  %v570_v0 = vld [vmem:[%s3578_s2 + $0x18] sm:$0xff] }
 0x2bb   : > { %v1132_v3 = vmul.f32 1.442695, %v1106_v62  ;;  %1898 = vst [vmem:[%s3466_s13 + $0x58] sm:$0xff] %v3523_v63  ;;  %v1107_v5 = vmul.f32 0.5, %v3523_v63  ;;  %1556 = vmatprep.subr.bf16.mxu0 %v2584_v51  ;;  %v569_v62 = vld [vmem:[%s3578_s2 + $0x10] sm:$0xff] }
 0x2bc   : > { %v1128_v4 = vmul.f32 1.442695, %v1104_v1  ;;  %v1105_v6 = vmul.f32 0.5, %v3529_v2  ;;  %1896 = vst [vmem:[%s3466_s13 + $0x48] sm:$0xff] %v3529_v2  ;;  %v568_v1 = vld [vmem:[%s3578_s2 + $0x8] sm:$0xff] }
 0x2bd   : > { %v1134_v12 = vmul.f32 1.442695, %v1107_v5 }
 0x2be   : > { %2613 = vpow2.f32 %v1128_v4  ;;  %v1130_v7 = vmul.f32 1.442695, %v1105_v6  ;;  %v2382_v8 = vpop.f32.mrb[28].mxu1  ;;  %1557 = vmatpush1.bf16.msra.mxu0 %v2582_v52 }
 0x2bf   : > { %2615 = vpow2.f32 %v1132_v3  ;;  %v3538_v9 = vadd.f32 %v2382_v8, %v3456_v20  ;;  %v1081_v10 = vpop.f32.mrb[29].mxu1  ;;  %1558 = vmatprep.subr.bf16.mxu0 %v2587_v53 }
 0x2c0   : > { %v2606_v11 = vpop.eup %2605  ;;  %2617 = vpow2.f32 %v1130_v7  ;;  %v3541_v14 = vadd.f32 %v3456_v20, %v1081_v10  ;;  %v2383_v15 = vpop.f32.mrb[30].mxu1 }
 0x2c1   : > { %v1110_v16 = vmul.f32 0.5, %v3538_v9  ;;  %1901 = vst [vmem:[%s3466_s13 + $0x70] sm:$0xff] %v3538_v9  ;;  %v3547_v17 = vadd.f32 %v2383_v15, %v3456_v20  ;;  %v1084_v18 = vpop.f32.mrb[31].mxu1  ;;  %1168 = vrot.lane.b32.xlu0 %v2606_v11, %s3022_s12  ;;  %2619 = vpow2.f32 %v1134_v12 }
 0x2c2   : > { %v2608_v19 = vpop.eup %2607  ;;  %v1108_v21 = vmul.f32 0.5, %v3541_v14  ;;  %1899 = vst [vmem:[%s3466_s13 + $0x60] sm:$0xff] %v3541_v14  ;;  %v3554_v22 = vadd.f32 %v3456_v20, %v1084_v18  ;;  %1559 = vmatpush1.bf16.msra.mxu0 %v2585_v54  ;;  %v580_v54 = vld [vmem:[%s3578_s2 + $0x68] sm:$0xff] }
 0x2c3   : > { %v1140_v24 = vmul.f32 1.442695, %v1110_v16  ;;  %v1111_v25 = vmul.f32 0.5, %v3547_v17  ;;  %1902 = vst [vmem:[%s3466_s13 + $0x78] sm:$0xff] %v3547_v17  ;;  %1170 = vrot.lane.b32.xlu1 %v2608_v19, %s3022_s12  ;;  %v2610_v27 = vpop.eup %2609  ;;  %1560 = vmatprep.subr.bf16.mxu0 %v2590_v55  ;;  %v571_v19 = vld [vmem:[%s3578_s2 + $0x20] sm:$0xff] }
 0x2c4   : > { %v1136_v28 = vmul.f32 1.442695, %v1108_v21  ;;  %v1109_v30 = vmul.f32 0.5, %v3554_v22  ;;  %1900 = vst [vmem:[%s3466_s13 + $0x68] sm:$0xff] %v3554_v22  ;;  %v2612_v31 = vpop.eup %2611 }
 0x2c5   : > { %1172 = vrot.lane.b32.xlu0 %v2610_v27, %s3022_s12  ;;  %v1142_v20 = vmul.f32 1.442695, %v1111_v25 }
 0x2c6   : > { %2621 = vpow2.f32 %v1136_v28  ;;  %v1138_v32 = vmul.f32 1.442695, %v1109_v30  ;;  %1561 = vmatpush1.bf16.msra.mxu0 %v2588_v56 }
 0x2c7   : > { %2623 = vpow2.f32 %v1140_v24  ;;  %1174 = vrot.lane.b32.xlu1 %v2612_v31, %s3022_s12  ;;  %v572_v24 = vld [vmem:[%s3578_s2 + $0x28] sm:$0xff] }
 0x2c8   : > { %v2614_v33 = vpop.eup %2613  ;;  %2625 = vpow2.f32 %v1138_v32  ;;  %v575_v32 = vld [vmem:[%s3578_s2 + $0x40] sm:$0xff] }
 0x2c9   : > { %v2616_v34 = vpop.eup %2615  ;;  %1176 = vrot.lane.b32.xlu0 %v2614_v33, %s3022_s12  ;;  %2627 = vpow2.f32 %v1142_v20 }
 0x2ca   : > { %v2618_v35 = vpop.eup %2617 }
 0x2cb   : > { %1178 = vrot.lane.b32.xlu1 %v2618_v35, %s3022_s12  ;;  %v2620_v36 = vpop.eup %2619 }
 0x2cd   : > { %1180 = vrot.lane.b32.xlu0 %v2616_v34, %s3022_s12 }
 0x2cf   : > { %1182 = vrot.lane.b32.xlu1 %v2620_v36, %s3022_s12  ;;  %v576_v36 = vld [vmem:[%s3578_s2 + $0x48] sm:$0xff] }
 0x2d0   : > { %v2622_v37 = vpop.eup %2621 }
 0x2d1   : > { %v2624_v41 = vpop.eup %2623  ;;  %1184 = vrot.lane.b32.xlu0 %v2622_v37, %s3022_s12 }
 0x2d2   : > { %v2626_v45 = vpop.eup %2625 }
 0x2d3   : > { %1186 = vrot.lane.b32.xlu1 %v2626_v45, %s3022_s12  ;;  %v2628_v47 = vpop.eup %2627 }
 0x2d5   : > { %1188 = vrot.lane.b32.xlu0 %v2624_v41, %s3022_s12  ;;  %v577_v41 = vld [vmem:[%s3578_s2 + $0x50] sm:$0xff] }
 0x2d7   : > { %1190 = vrot.lane.b32.xlu1 %v2628_v47, %s3022_s12 }
 0x322   : > { %v1165_v58 = vpop.permute.xlu1 %1164 }
 0x323   : > { %v1161_v61 = vpop.permute.xlu0 %1160  ;;  %v1210_v5 = vmul.f32 %v1165_v58, %v569_v62 }
 0x324   : > { %v1208_v3 = vmul.f32 %v1161_v61, %v567_v59  ;;  %v581_v59 = vld [vmem:[%s3578_s2 + $0x70] sm:$0xff] }
 0x325   : > { %v1226_v15 = vadd.f32 %v1210_v5, %v3459_v13 }
 0x326   : > { %v1167_v4 = vpop.permute.xlu1 %1166  ;;  %v1224_v11 = vadd.f32 %v1208_v3, %v3462_v23  ;;  %v573_v23 = vld [vmem:[%s3578_s2 + $0x30] sm:$0xff] }
 0x327   : > { %v1211_v6 = vmul.f32 %v1167_v4, %v570_v0  ;;  %v1163_v7 = vpop.permute.xlu0 %1162  ;;  %v582_v0 = vld [vmem:[%s3578_s2 + $0x78] sm:$0xff] }
 0x328   : > { %v1209_v8 = vmul.f32 %v1163_v7, %v568_v1 }
 0x329   : > { %v1227_v10 = vadd.f32 %v1211_v6, %v3471_v26 }
 0x32a   : > { %v1225_v12 = vadd.f32 %v1209_v8, %v3477_v29  ;;  %v574_v29 = vld [vmem:[%s3578_s2 + $0x38] sm:$0xff] }
 0x32b   : > { %v1241_v18 = vpack.c.bf16 %v1227_v10, %v1226_v15  ;;  %v2596_v10 = vld [vmem:[#allocation10 + $0x74] ss:$8 sps:$4 sm:$0xff]  }
 0x32c   : > { %v1240_v16 = vpack.c.bf16 %v1225_v12, %v1224_v11  ;;  %v2594_v11 = vld [vmem:[#allocation10 + $0x70] ss:$8 sps:$4 sm:$0xff]   ;;  %v3023_v12 = vmov 0  }
 0x32d   : > { %1582 = vmatprep.mubr.bf16.mxu0 %v3023_v12 }
 0x32e   : > { %2392 = vmatprep.mubr.msk.bf16.mxu1 %vm1296_vm0, %v1240_v16  ;;  %v1259_v16 = vld [vmem:[%s3345_s5 + $0x18] sm:$0xff] }
 0x32f   : > { %2393 = vmatmul.mubr.msk.bf16.vlgmr.msra.gmra.mrb[32].mxu1 %vm1296_vm0, %v1241_v18 }
 0x333   : > { %v1169_v21 = vpop.permute.xlu0 %1168 }
 0x334   : > { %v1212_v26 = vmul.f32 %v1169_v21, %v571_v19  ;;  %v1257_v21 = vld [vmem:[%s3345_s5 + $0x8] sm:$0xff] }
 0x335   : > { %v1171_v25 = vpop.permute.xlu1 %1170 }
 0x336   : > { %v1213_v27 = vmul.f32 %v1171_v25, %v572_v24  ;;  %v1228_v13 = vadd.f32 %v1212_v26, %v3489_v42 }
 0x337   : > { %v1173_v28 = vpop.permute.xlu0 %1172 }
 0x338   : > { %v1229_v30 = vadd.f32 %v1213_v27, %v3503_v48  ;;  %v1214_v31 = vmul.f32 %v1173_v28, %v573_v23 }
 0x339   : > { %v1175_v20 = vpop.permute.xlu1 %1174 }
 0x33a   : > { %v1242_v33 = vpack.c.bf16 %v1229_v30, %v1228_v13  ;;  %v1215_v34 = vmul.f32 %v1175_v20, %v574_v29  ;;  %v1230_v37 = vadd.f32 %v1214_v31, %v3486_v39 }
 0x33b   : > { %v1177_v35 = vpop.permute.xlu0 %1176 }
 0x33c   : > { %v1231_v38 = vadd.f32 %v1215_v34, %v3495_v44  ;;  %v1216_v40 = vmul.f32 %v1177_v35, %v575_v32  ;;  %2396 = vmatprep.mubr.msk.bf16.mxu1 %vm1296_vm0, %v1242_v33  ;;  %v579_v44 = vld [vmem:[%s3578_s2 + $0x60] sm:$0xff]  ;;  %v1262_v32 = vld [vmem:[%s3345_s5 + $0x30] sm:$0xff]  ;;  %v1263_v35 = vld [vmem:[%s3345_s5 + $0x38] sm:$0xff] }
 0x33d   : > { %v1179_v42 = vpop.permute.xlu1 %1178  ;;  %v1260_v33 = vld [vmem:[%s3345_s5 + $0x20] sm:$0xff] }
 0x33e   : > { %v1243_v48 = vpack.c.bf16 %v1231_v38, %v1230_v37  ;;  %v1217_v43 = vmul.f32 %v1179_v42, %v576_v36  ;;  %v1232_v47 = vadd.f32 %v1216_v40, %v3517_v60  ;;  %v1261_v38 = vld [vmem:[%s3345_s5 + $0x28] sm:$0xff] }
 0x33f   : > { %v1181_v45 = vpop.permute.xlu0 %1180 }
 0x340   : > { %v1233_v49 = vadd.f32 %v1217_v43, %v3529_v2  ;;  %v1218_v50 = vmul.f32 %v1181_v45, %v577_v41  ;;  %2397 = vmatmul.mubr.msk.bf16.gmra.mrb[36].mxu1 %vm1296_vm0, %v1243_v48 }
 0x341   : > { %v1183_v39 = vpop.permute.xlu1 %1182 }
 0x342   : > { %v1244_v51 = vpack.c.bf16 %v1233_v49, %v1232_v47  ;;  %v1219_v52 = vmul.f32 %v1183_v39, %v578_v46  ;;  %v1234_v55 = vadd.f32 %v1218_v50, %v3514_v57  ;;  %v1266_v50 = vld [vmem:[%s3345_s5 + $0x50] sm:$0xff] }
 0x343   : > { %v1185_v53 = vpop.permute.xlu0 %1184 }
 0x344   : > { %v1235_v56 = vadd.f32 %v1219_v52, %v3523_v63  ;;  %v1220_v58 = vmul.f32 %v1185_v53, %v579_v44  ;;  %2400 = vmatprep.mubr.msk.bf16.mxu1 %vm1296_vm0, %v1244_v51  ;;  %v1264_v44 = vld [vmem:[%s3345_s5 + $0x40] sm:$0xff]  ;;  %v1267_v53 = vld [vmem:[%s3345_s5 + $0x58] sm:$0xff] }
 0x345   : > { %v1187_v60 = vpop.permute.xlu1 %1186 }
 0x346   : > { %v1245_v2 = vpack.c.bf16 %v1235_v56, %v1234_v55  ;;  %v1221_v61 = vmul.f32 %v1187_v60, %v580_v54  ;;  %v1236_v1 = vadd.f32 %v1220_v58, %v3541_v14  ;;  %v2593_v14 = vld [vmem:[#allocation10 + $0x64] ss:$8 sps:$4 sm:$0xff]  }
 0x347   : > { %v1189_v62 = vpop.permute.xlu0 %1188  ;;  %1562 = vmatprep.subr.bf16.mxu0 %v2593_v14  ;;  %v1265_v56 = vld [vmem:[%s3345_s5 + $0x48] sm:$0xff] }
 0x348   : > { %v1237_v3 = vadd.f32 %v1221_v61, %v3554_v22  ;;  %v1222_v4 = vmul.f32 %v1189_v62, %v581_v59  ;;  %2401 = vmatmul.mubr.msk.bf16.gmra.mrb[40].mxu1 %vm1296_vm0, %v1245_v2  ;;  %v2591_v22 = vld [vmem:[#allocation10 + $0x60] ss:$8 sps:$4 sm:$0xff]  }
 0x349   : > { %v1191_v5 = vpop.permute.xlu1 %1190  ;;  %1563 = vmatpush1.bf16.msra.mxu0 %v2591_v22  ;;  %v1269_v22 = vld [vmem:[%s3345_s5 + $0x68] sm:$0xff] }
 0x34a   : > { %v1246_v57 = vpack.c.bf16 %v1237_v3, %v1236_v1  ;;  %v1223_v6 = vmul.f32 %v1191_v5, %v582_v0  ;;  %v1238_v63 = vadd.f32 %v1222_v4, %v3538_v9  ;;  %1564 = vmatprep.subr.bf16.mxu0 %v2596_v10  ;;  %v1258_v9 = vld [vmem:[%s3345_s5 + $0x10] sm:$0xff] }
 0x34b   : > { %v1270_v4 = vld [vmem:[%s3345_s5 + $0x70] sm:$0xff] }
 0x34c   : > { %v1239_v7 = vadd.f32 %v1223_v6, %v3547_v17  ;;  %2404 = vmatprep.mubr.msk.bf16.mxu1 %vm1296_vm0, %v1246_v57  ;;  %v1256_v17 = vld [vmem:[%s3345_s5] sm:$0xff] }
 0x34d   : > { %1565 = vmatpush1.bf16.msra.mxu0 %v2594_v11  ;;  %v1268_v57 = vld [vmem:[%s3345_s5 + $0x60] sm:$0xff] }
 0x34e   : > { %v1247_v8 = vpack.c.bf16 %v1239_v7, %v1238_v63  ;;  %v1271_v7 = vld [vmem:[%s3345_s5 + $0x78] sm:$0xff]  ;;  %s2259_s5 = sshll.u32 %s3111_s21, 11 }
 0x34f   : > { %s3649_s29 = scalar_lea.hbm %s3855_s25, %s2259_s5 }
 0x350   : > { %2405 = vmatmul.mubr.msk.bf16.gmra.mrb[44].mxu1 %vm1296_vm0, %v1247_v8 }
 0x402   : > { %v2394_v15 = vpop.f32.mrb[32].mxu1 }
 0x403   : > { %v1364_v18 = vadd.f32 %v2394_v15, %v1258_v9  ;;  %v1355_v19 = vpop.f32.mrb[33].mxu1 }
 0x404   : > { %v1356_v24 = vadd.f32 %v1355_v19, %v1256_v17  ;;  %v2395_v26 = vpop.f32.mrb[34].mxu1 }
 0x405   : > { %v1367_v25 = vadd.f32 %v2395_v26, %v1259_v16  ;;  %v1358_v23 = vpop.f32.mrb[35].mxu1  ;;  %v1420_v28 = vmax.f32 %v1364_v18, 0.0 }
 0x406   : > { %v1359_v27 = vadd.f32 %v1358_v23, %v1257_v21  ;;  %v1418_v13 = vmax.f32 %v1356_v24, 0.0 }
 0x407   : > { %v1421_v29 = vmax.f32 %v1367_v25, 0.0 }
 0x408   : > { %v1419_v30 = vmax.f32 %v1359_v27, 0.0 }
 0x409   : > { %v1435_v31 = vpack.c.bf16 %v1421_v29, %v1420_v28 }
 0x40a   : > { %v1434_v20 = vpack.c.bf16 %v1419_v30, %v1418_v13 }
 0x40c   : > { %1583 = vmatmul.mubr.bf16.vlgmr.msra.gmra.mrb[16].mxu0 %v1434_v20 }
 0x40d   : > { %1592 = vmatprep.mubr.bf16.mxu0 %v3023_v12 }
 0x413   : > { %v2398_v34 = vpop.f32.mrb[36].mxu1 }
 0x414   : > { %v1380_v36 = vadd.f32 %v2398_v34, %v1262_v32  ;;  %v1371_v37 = vpop.f32.mrb[37].mxu1  ;;  %1593 = vmatmul.mubr.bf16.gmra.mrb[20].mxu0 %v1435_v31 }
 0x415   : > { %v1372_v40 = vadd.f32 %v1371_v37, %v1260_v33  ;;  %v2399_v42 = vpop.f32.mrb[38].mxu1  ;;  %1602 = vmatprep.mubr.bf16.mxu0 %v3023_v12 }
 0x416   : > { %v1383_v41 = vadd.f32 %v2399_v42, %v1263_v35  ;;  %v1374_v48 = vpop.f32.mrb[39].mxu1  ;;  %v1424_v45 = vmax.f32 %v1380_v36, 0.0 }
 0x417   : > { %v1375_v43 = vadd.f32 %v1374_v48, %v1261_v38  ;;  %v1422_v47 = vmax.f32 %v1372_v40, 0.0 }
 0x418   : > { %v1425_v46 = vmax.f32 %v1383_v41, 0.0 }
 0x419   : > { %v1423_v49 = vmax.f32 %v1375_v43, 0.0 }
 0x41a   : > { %v1437_v39 = vpack.c.bf16 %v1425_v46, %v1424_v45 }
 0x41b   : > { %v1436_v51 = vpack.c.bf16 %v1423_v49, %v1422_v47  ;;  %v2402_v52 = vpop.f32.mrb[40].mxu1 }
 0x41c   : > { %v1396_v54 = vadd.f32 %v2402_v52, %v1266_v50  ;;  %v1387_v55 = vpop.f32.mrb[41].mxu1 }
 0x41d   : > { %v1388_v58 = vadd.f32 %v1387_v55, %v1264_v44  ;;  %v2403_v60 = vpop.f32.mrb[42].mxu1  ;;  %1603 = vmatmul.mubr.bf16.gmra.mrb[24].mxu0 %v1436_v51 }
 0x41e   : > { %v1399_v59 = vadd.f32 %v2403_v60, %v1267_v53  ;;  %v1390_v2 = vpop.f32.mrb[43].mxu1  ;;  %1612 = vmatprep.mubr.bf16.mxu0 %v3023_v12  ;;  %v1428_v62 = vmax.f32 %v1396_v54, 0.0 }
 0x41f   : > { %v1391_v61 = vadd.f32 %v1390_v2, %v1265_v56  ;;  %v1426_v1 = vmax.f32 %v1388_v58, 0.0 }
 0x420   : > { %v1429_v0 = vmax.f32 %v1399_v59, 0.0 }
 0x421   : > { %v1427_v3 = vmax.f32 %v1391_v61, 0.0 }
 0x422   : > { %v1439_v5 = vpack.c.bf16 %v1429_v0, %v1428_v62 }
 0x423   : > { %v1438_v6 = vpack.c.bf16 %v1427_v3, %v1426_v1  ;;  %v2406_v63 = vpop.f32.mrb[44].mxu1 }
 0x424   : > { %v1412_v8 = vadd.f32 %v2406_v63, %v1270_v4  ;;  %v1403_v14 = vpop.f32.mrb[45].mxu1 }
 0x425   : > { %v1404_v10 = vadd.f32 %v1403_v14, %v1268_v57  ;;  %v2407_v11 = vpop.f32.mrb[46].mxu1  ;;  %1613 = vmatmul.mubr.bf16.gmra.mrb[28].mxu0 %v1437_v39 }
 0x426   : > { %v1415_v9 = vadd.f32 %v2407_v11, %v1271_v7  ;;  %v1406_v17 = vpop.f32.mrb[47].mxu1  ;;  %1622 = vmatprep.mubr.bf16.mxu0 %v3023_v12  ;;  %v1432_v16 = vmax.f32 %v1412_v8, 0.0 }
 0x427   : > { %v1407_v15 = vadd.f32 %v1406_v17, %v1269_v22  ;;  %v1430_v19 = vmax.f32 %v1404_v10, 0.0 }
 0x428   : > { %v1433_v18 = vmax.f32 %v1415_v9, 0.0 }
 0x429   : > { %v1431_v21 = vmax.f32 %v1407_v15, 0.0 }
 0x42a   : > { %v1441_v24 = vpack.c.bf16 %v1433_v18, %v1432_v16 }
 0x42b   : > { %v1440_v26 = vpack.c.bf16 %v1431_v21, %v1430_v19 }
 0x42d   : > { %1623 = vmatmul.mubr.bf16.gmra.mrb[32].mxu0 %v1438_v6 }
 0x42e   : > { %1632 = vmatprep.mubr.bf16.mxu0 %v3023_v12 }
 0x435   : > { %1633 = vmatmul.mubr.bf16.gmra.mrb[36].mxu0 %v1439_v5 }
 0x436   : > { %1642 = vmatprep.mubr.bf16.mxu0 %v3023_v12 }
 0x43d   : > { %1643 = vmatmul.mubr.bf16.gmra.mrb[40].mxu0 %v1440_v26 }
 0x43e   : > { %1652 = vmatprep.mubr.bf16.mxu0 %v3023_v12 }
 0x445   : > { %1653 = vmatmul.mubr.bf16.gmra.mrb[44].mxu0 %v1441_v24 }
 0x446   : > { %2914 = shalt.err (!%p2911_p9)
}
 0x447   : > { %s2915_s7 = scalar_lea.hbm %s3649_s29, 2048  ;;  %s2919_s13 = scalar_lea.hbm %s3855_s25, 4096 }
 0x448   : > { %p2916_p13 = scmp.ne.s32.totalorder %s3649_s29, %s2915_s7  ;;  %p2920_p12 = scmp.lt.u32.totalorder %s3649_s29, %s3855_s25 }
 0x449   : > { %p2921_p2 = scmp.lt.u32.totalorder %s2919_s13, %s2915_s7  ;;  %p2923_p4 = scmp.lt.u32.totalorder %s2915_s7, %s3649_s29 }
 0x44a   : > { %p2917_p11 = pnand %p2916_p13, %p3238_p5 }
 0x44b   : > { %p2922_p1 = por %p2921_p2, %p2920_p12 }
 0x44c   : > { %p2918_p7 = pneg %p2917_p11 }
 0x44d   : > { %p2924_p0 = por %p2923_p4, %p2922_p1 }
 0x44f   : > { %p2925_p8 = pnand %p2924_p0, %p2918_p7 }
 0x451   : > { %2928 = shalt.err (!%p2925_p8)
}
 0x452   : > { %s3025_s15 = smov 128   ;;  %s3026_s2 = smov 8   ;;  %v1460_v12 = vlaneseq }
 0x453   : > { %2441 = dma.vmem_to_hbm [thread:$0]  (%p3238_p5), %s3651_s11, 2048, %s3649_s29, %s1909_s8, %s3025_s15, %s3025_s15, %s3026_s2  }
 0x454   : > { %v1461_v25 = vshrl.u32 %v1460_v12, 7  ;;  %s3856_s16 = sld [smem:[#allocation27_spill]]  ;;  %s2137_s11 = sshll.u32 %s3330_s17, 8 }
 0x455   : > { %s3700_s29 = scalar_lea.vmem [#allocation11], %s2137_s11  ;;  %s2258_s8 = sshll.u32 %s3111_s21, 12 }
 0x456   : > { %v1462_v23 = vsub.s32 0, %v1461_v25  ;;  %v1466_v28 = vsub.s32 1, %v1461_v25  ;;  %s1923_s23 = sshll.u32 %s3700_s29, 4  ;;  %s3857_s24 = sld [smem:[#allocation28_spill]]  ;;  %s3755_s23 = int_to_ptr.vmem [resolvable:$true] %s1923_s23 }
 0x457   : > { %s1904_s21 = scalar_lea.sflag [#allocation4], %s3330_s17  ;;  %s2929_s30 = scalar_lea.vmem %s3755_s23, 4096 }
 0x458   : > { %p2930_p6 = scmp.ne.s32.totalorder %s3755_s23, %s2929_s30  ;;  %s3027_s26 = smov [#allocation11]  }
 0x459   : > { %s2933_s13 = sshll.u32 %s3027_s26, 4  ;;  %s2934_s13 = int_to_ptr.vmem [resolvable:$false] %s2933_s13 }
 0x45a   : > { %v1458_v27 = vld [vmem:[%s3856_s16] sm:$0x3]  ;;  %p2931_p10 = pnand %p2930_p6, %p3238_p5  ;;  %s2935_s12 = scalar_lea.vmem %s2934_s13, 8192 }
 0x45b   : > { %v3680_v29 = vrot.slane %v1458_v27, %v1462_v23  ;;  %v3682_v13 = vrot.slane %v1458_v27, %v1466_v28  ;;  %p2936_p9 = scmp.lt.s32.totalorder %s3755_s23, %s2934_s13  ;;  %p2937_p13 = scmp.lt.s32.totalorder %s2935_s12, %s2929_s30 }
 0x45c   : > { %s3753_s7 = scalar_lea.hbm %s3857_s24, %s2258_s8  ;;  %p2932_p3 = pneg %p2931_p10 }
 0x45d   : > { %p2938_p11 = por %p2937_p13, %p2936_p9 }
 0x45f   : > { %p2939_p7 = pnand %p2938_p11, %p2932_p3 }
 0x4df   : > { %v1584_v30 = vpop.f32.mrb[16].mxu0 }
 0x4e0   : > { %v1585_v31 = vadd.f32 %v1584_v30, %v3680_v29  ;;  %v1586_v20 = vpop.f32.mrb[17].mxu0 }
 0x4e1   : > { %v1587_v32 = vadd.f32 %v1586_v20, %v3682_v13  ;;  %v1588_v33 = vpop.f32.mrb[18].mxu0 }
 0x4e2   : > { %v2213_v34 = vmul.f32 -1.442695, %v1585_v31  ;;  %v1589_v35 = vadd.f32 %v1588_v33, %v3680_v29  ;;  %v1590_v36 = vpop.f32.mrb[19].mxu0 }
 0x4e3   : > { %v2214_v37 = vmul.f32 -1.442695, %v1587_v32  ;;  %v1591_v38 = vadd.f32 %v1590_v36, %v3682_v13 }
 0x4e4   : > { %2629 = vpow2.f32 %v2213_v34  ;;  %v2215_v40 = vmul.f32 -1.442695, %v1589_v35 }
 0x4e5   : > { %2631 = vpow2.f32 %v2214_v37  ;;  %v2216_v42 = vmul.f32 -1.442695, %v1591_v38 }
 0x4e6   : > { %2633 = vpow2.f32 %v2215_v40 }
 0x4e7   : > { %2635 = vpow2.f32 %v2216_v42  ;;  %v1594_v41 = vpop.f32.mrb[20].mxu0 }
 0x4e8   : > { %v1595_v48 = vadd.f32 %v1594_v41, %v3680_v29  ;;  %v1596_v43 = vpop.f32.mrb[21].mxu0 }
 0x4e9   : > { %v1597_v45 = vadd.f32 %v1596_v43, %v3682_v13  ;;  %v1598_v46 = vpop.f32.mrb[22].mxu0 }
 0x4ea   : > { %v2217_v47 = vmul.f32 -1.442695, %v1595_v48  ;;  %v1599_v49 = vadd.f32 %v1598_v46, %v3680_v29  ;;  %v1600_v50 = vpop.f32.mrb[23].mxu0 }
 0x4eb   : > { %v2218_v39 = vmul.f32 -1.442695, %v1597_v45  ;;  %v1601_v44 = vadd.f32 %v1600_v50, %v3682_v13 }
 0x4ec   : > { %2637 = vpow2.f32 %v2217_v47  ;;  %v2219_v51 = vmul.f32 -1.442695, %v1599_v49 }
 0x4ed   : > { %2639 = vpow2.f32 %v2218_v39  ;;  %v2220_v52 = vmul.f32 -1.442695, %v1601_v44 }
 0x4ee   : > { %v2630_v53 = vpop.eup %2629  ;;  %2641 = vpow2.f32 %v2219_v51 }
 0x4ef   : > { %v2632_v54 = vpop.eup %2631  ;;  %v1759_v55 = vadd.f32 1.0, %v2630_v53  ;;  %2643 = vpow2.f32 %v2220_v52 }
 0x4f0   : > { %v2634_v56 = vpop.eup %2633  ;;  %v1760_v58 = vadd.f32 1.0, %v2632_v54  ;;  %v1604_v60 = vpop.f32.mrb[24].mxu0 }
 0x4f1   : > { %v2636_v59 = vpop.eup %2635  ;;  %2645 = vrcp.f32 %v1759_v55  ;;  %v1761_v2 = vadd.f32 1.0, %v2634_v56  ;;  %v1605_v61 = vadd.f32 %v1604_v60, %v3680_v29  ;;  %v1606_v62 = vpop.f32.mrb[25].mxu0 }
 0x4f2   : > { %2647 = vrcp.f32 %v1760_v58  ;;  %v1762_v0 = vadd.f32 1.0, %v2636_v59  ;;  %v1607_v1 = vadd.f32 %v1606_v62, %v3682_v13  ;;  %v1608_v3 = vpop.f32.mrb[26].mxu0 }
 0x4f3   : > { %2649 = vrcp.f32 %v1761_v2  ;;  %v2221_v4 = vmul.f32 -1.442695, %v1605_v61  ;;  %v1609_v5 = vadd.f32 %v1608_v3, %v3680_v29  ;;  %v1610_v57 = vpop.f32.mrb[27].mxu0 }
 0x4f4   : > { %2651 = vrcp.f32 %v1762_v0  ;;  %v2222_v6 = vmul.f32 -1.442695, %v1607_v1  ;;  %v1611_v63 = vadd.f32 %v1610_v57, %v3682_v13 }
 0x4f5   : > { %2653 = vpow2.f32 %v2221_v4  ;;  %v2223_v7 = vmul.f32 -1.442695, %v1609_v5 }
 0x4f6   : > { %v2638_v8 = vpop.eup %2637  ;;  %2655 = vpow2.f32 %v2222_v6  ;;  %v2224_v14 = vmul.f32 -1.442695, %v1611_v63 }
 0x4f7   : > { %v2640_v22 = vpop.eup %2639  ;;  %v1763_v10 = vadd.f32 1.0, %v2638_v8  ;;  %2657 = vpow2.f32 %v2223_v7 }
 0x4f8   : > { %v2642_v11 = vpop.eup %2641  ;;  %v1764_v9 = vadd.f32 1.0, %v2640_v22  ;;  %2659 = vpow2.f32 %v2224_v14  ;;  %v1614_v17 = vpop.f32.mrb[28].mxu0 }
 0x4f9   : > { %v2644_v15 = vpop.eup %2643  ;;  %2661 = vrcp.f32 %v1763_v10  ;;  %v1765_v16 = vadd.f32 1.0, %v2642_v11  ;;  %v1615_v18 = vadd.f32 %v1614_v17, %v3680_v29  ;;  %v1616_v19 = vpop.f32.mrb[29].mxu0 }
 0x4fa   : > { %2663 = vrcp.f32 %v1764_v9  ;;  %v1766_v21 = vadd.f32 1.0, %v2644_v15  ;;  %v1617_v24 = vadd.f32 %v1616_v19, %v3682_v13  ;;  %v1618_v26 = vpop.f32.mrb[30].mxu0 }
 0x4fb   : > { %v2646_v12 = vpop.eup %2645  ;;  %2665 = vrcp.f32 %v1765_v16  ;;  %v2225_v25 = vmul.f32 -1.442695, %v1615_v18  ;;  %v1619_v23 = vadd.f32 %v1618_v26, %v3680_v29  ;;  %v1620_v27 = vpop.f32.mrb[31].mxu0 }
 0x4fc   : > { %v2648_v28 = vpop.eup %2647  ;;  %1855 = vst [vmem:[%s3700_s29] sm:$0xff] %v2646_v12  ;;  %2667 = vrcp.f32 %v1766_v21  ;;  %v2226_v30 = vmul.f32 -1.442695, %v1617_v24  ;;  %v1621_v31 = vadd.f32 %v1620_v27, %v3682_v13 }
 0x4fd   : > { %v2650_v20 = vpop.eup %2649  ;;  %1856 = vst [vmem:[%s3700_s29 + $0x8] sm:$0xff] %v2648_v28  ;;  %2669 = vpow2.f32 %v2225_v25  ;;  %v2227_v32 = vmul.f32 -1.442695, %v1619_v23 }
 0x4fe   : > { %v2652_v33 = vpop.eup %2651  ;;  %1857 = vst [vmem:[%s3700_s29 + $0x10] sm:$0xff] %v2650_v20  ;;  %2671 = vpow2.f32 %v2226_v30  ;;  %v2228_v34 = vmul.f32 -1.442695, %v1621_v31 }
 0x4ff   : > { %v2654_v35 = vpop.eup %2653  ;;  %1858 = vst [vmem:[%s3700_s29 + $0x18] sm:$0xff] %v2652_v33  ;;  %2673 = vpow2.f32 %v2227_v32 }
 0x500   : > { %v2656_v36 = vpop.eup %2655  ;;  %v1767_v37 = vadd.f32 1.0, %v2654_v35  ;;  %2675 = vpow2.f32 %v2228_v34  ;;  %v1624_v38 = vpop.f32.mrb[32].mxu0 }
 0x501   : > { %v2658_v40 = vpop.eup %2657  ;;  %v1768_v42 = vadd.f32 1.0, %v2656_v36  ;;  %v1625_v41 = vadd.f32 %v1624_v38, %v3680_v29  ;;  %v1626_v48 = vpop.f32.mrb[33].mxu0 }
 0x502   : > { %v2660_v43 = vpop.eup %2659  ;;  %2677 = vrcp.f32 %v1767_v37  ;;  %v1769_v45 = vadd.f32 1.0, %v2658_v40  ;;  %v1627_v46 = vadd.f32 %v1626_v48, %v3682_v13  ;;  %v1628_v47 = vpop.f32.mrb[34].mxu0 }
 0x503   : > { %v2662_v49 = vpop.eup %2661  ;;  %2679 = vrcp.f32 %v1768_v42  ;;  %v1770_v50 = vadd.f32 1.0, %v2660_v43  ;;  %v2229_v39 = vmul.f32 -1.442695, %v1625_v41  ;;  %v1629_v44 = vadd.f32 %v1628_v47, %v3680_v29  ;;  %v1630_v51 = vpop.f32.mrb[35].mxu0 }
 0x504   : > { %v2664_v52 = vpop.eup %2663  ;;  %1859 = vst [vmem:[%s3700_s29 + $0x20] sm:$0xff] %v2662_v49  ;;  %2681 = vrcp.f32 %v1769_v45  ;;  %v2230_v53 = vmul.f32 -1.442695, %v1627_v46  ;;  %v1631_v54 = vadd.f32 %v1630_v51, %v3682_v13 }
 0x505   : > { %v2666_v55 = vpop.eup %2665  ;;  %1860 = vst [vmem:[%s3700_s29 + $0x28] sm:$0xff] %v2664_v52  ;;  %2683 = vrcp.f32 %v1770_v50  ;;  %v2231_v56 = vmul.f32 -1.442695, %v1629_v44 }
 0x506   : > { %v2668_v58 = vpop.eup %2667  ;;  %1861 = vst [vmem:[%s3700_s29 + $0x30] sm:$0xff] %v2666_v55  ;;  %2685 = vpow2.f32 %v2229_v39  ;;  %v2232_v60 = vmul.f32 -1.442695, %v1631_v54 }
 0x507   : > { %v2670_v59 = vpop.eup %2669  ;;  %1862 = vst [vmem:[%s3700_s29 + $0x38] sm:$0xff] %v2668_v58  ;;  %2687 = vpow2.f32 %v2230_v53 }
 0x508   : > { %v2672_v2 = vpop.eup %2671  ;;  %v1771_v61 = vadd.f32 1.0, %v2670_v59  ;;  %2689 = vpow2.f32 %v2231_v56  ;;  %v1634_v62 = vpop.f32.mrb[36].mxu0 }
 0x509   : > { %v2674_v0 = vpop.eup %2673  ;;  %v1772_v1 = vadd.f32 1.0, %v2672_v2  ;;  %2691 = vpow2.f32 %v2232_v60  ;;  %v1635_v3 = vadd.f32 %v1634_v62, %v3680_v29  ;;  %v1636_v4 = vpop.f32.mrb[37].mxu0 }
 0x50a   : > { %v2676_v5 = vpop.eup %2675  ;;  %2693 = vrcp.f32 %v1771_v61  ;;  %v1773_v57 = vadd.f32 1.0, %v2674_v0  ;;  %v1637_v6 = vadd.f32 %v1636_v4, %v3682_v13  ;;  %v1638_v63 = vpop.f32.mrb[38].mxu0 }
 0x50b   : > { %2695 = vrcp.f32 %v1772_v1  ;;  %v1774_v7 = vadd.f32 1.0, %v2676_v5  ;;  %v2233_v8 = vmul.f32 -1.442695, %v1635_v3  ;;  %v1639_v14 = vadd.f32 %v1638_v63, %v3680_v29  ;;  %v1640_v22 = vpop.f32.mrb[39].mxu0 }
 0x50c   : > { %v2678_v10 = vpop.eup %2677  ;;  %2697 = vrcp.f32 %v1773_v57  ;;  %v2234_v11 = vmul.f32 -1.442695, %v1637_v6  ;;  %v1641_v9 = vadd.f32 %v1640_v22, %v3682_v13 }
 0x50d   : > { %v2680_v17 = vpop.eup %2679  ;;  %1863 = vst [vmem:[%s3700_s29 + $0x40] sm:$0xff] %v2678_v10  ;;  %2699 = vrcp.f32 %v1774_v7  ;;  %v2235_v15 = vmul.f32 -1.442695, %v1639_v14 }
 0x50e   : > { %v2682_v16 = vpop.eup %2681  ;;  %1864 = vst [vmem:[%s3700_s29 + $0x48] sm:$0xff] %v2680_v17  ;;  %2701 = vpow2.f32 %v2233_v8  ;;  %v2236_v18 = vmul.f32 -1.442695, %v1641_v9 }
 0x50f   : > { %v2684_v19 = vpop.eup %2683  ;;  %1865 = vst [vmem:[%s3700_s29 + $0x50] sm:$0xff] %v2682_v16  ;;  %2703 = vpow2.f32 %v2234_v11 }
 0x510   : > { %v2686_v21 = vpop.eup %2685  ;;  %1866 = vst [vmem:[%s3700_s29 + $0x58] sm:$0xff] %v2684_v19  ;;  %2705 = vpow2.f32 %v2235_v15  ;;  %v1644_v24 = vpop.f32.mrb[40].mxu0 }
 0x511   : > { %v2688_v26 = vpop.eup %2687  ;;  %v1775_v12 = vadd.f32 1.0, %v2686_v21  ;;  %2707 = vpow2.f32 %v2236_v18  ;;  %v1645_v25 = vadd.f32 %v1644_v24, %v3680_v29  ;;  %v1646_v23 = vpop.f32.mrb[41].mxu0 }
 0x512   : > { %v2690_v27 = vpop.eup %2689  ;;  %v1776_v28 = vadd.f32 1.0, %v2688_v26  ;;  %v1647_v30 = vadd.f32 %v1646_v23, %v3682_v13  ;;  %v1648_v31 = vpop.f32.mrb[42].mxu0 }
 0x513   : > { %v2692_v20 = vpop.eup %2691  ;;  %2709 = vrcp.f32 %v1775_v12  ;;  %v1777_v32 = vadd.f32 1.0, %v2690_v27  ;;  %v2237_v33 = vmul.f32 -1.442695, %v1645_v25  ;;  %v1649_v34 = vadd.f32 %v1648_v31, %v3680_v29  ;;  %v1650_v35 = vpop.f32.mrb[43].mxu0 }
 0x514   : > { %v2694_v36 = vpop.eup %2693  ;;  %2711 = vrcp.f32 %v1776_v28  ;;  %v1778_v37 = vadd.f32 1.0, %v2692_v20  ;;  %v2238_v38 = vmul.f32 -1.442695, %v1647_v30  ;;  %v1651_v40 = vadd.f32 %v1650_v35, %v3682_v13 }
 0x515   : > { %v2696_v42 = vpop.eup %2695  ;;  %1867 = vst [vmem:[%s3700_s29 + $0x60] sm:$0xff] %v2694_v36  ;;  %2713 = vrcp.f32 %v1777_v32  ;;  %v2239_v41 = vmul.f32 -1.442695, %v1649_v34 }
 0x516   : > { %v2698_v48 = vpop.eup %2697  ;;  %1868 = vst [vmem:[%s3700_s29 + $0x68] sm:$0xff] %v2696_v42  ;;  %2715 = vrcp.f32 %v1778_v37  ;;  %v2240_v43 = vmul.f32 -1.442695, %v1651_v40 }
 0x517   : > { %v2700_v45 = vpop.eup %2699  ;;  %1869 = vst [vmem:[%s3700_s29 + $0x70] sm:$0xff] %v2698_v48  ;;  %2717 = vpow2.f32 %v2237_v33 }
 0x518   : > { %v2702_v46 = vpop.eup %2701  ;;  %1870 = vst [vmem:[%s3700_s29 + $0x78] sm:$0xff] %v2700_v45  ;;  %2719 = vpow2.f32 %v2238_v38  ;;  %v1654_v47 = vpop.f32.mrb[44].mxu0 }
 0x519   : > { %v2704_v49 = vpop.eup %2703  ;;  %v1779_v50 = vadd.f32 1.0, %v2702_v46  ;;  %2721 = vpow2.f32 %v2239_v41  ;;  %v1655_v39 = vadd.f32 %v1654_v47, %v3680_v29  ;;  %v1656_v44 = vpop.f32.mrb[45].mxu0 }
 0x51a   : > { %v2706_v51 = vpop.eup %2705  ;;  %v1780_v52 = vadd.f32 1.0, %v2704_v49  ;;  %2723 = vpow2.f32 %v2240_v43  ;;  %v1657_v53 = vadd.f32 %v1656_v44, %v3682_v13  ;;  %v1658_v54 = vpop.f32.mrb[46].mxu0 }
 0x51b   : > { %v2708_v55 = vpop.eup %2707  ;;  %2725 = vrcp.f32 %v1779_v50  ;;  %v1781_v56 = vadd.f32 1.0, %v2706_v51  ;;  %v2241_v58 = vmul.f32 -1.442695, %v1655_v39  ;;  %v1659_v60 = vadd.f32 %v1658_v54, %v3680_v29  ;;  %v1660_v59 = vpop.f32.mrb[47].mxu0 }
 0x51c   : > { %2727 = vrcp.f32 %v1780_v52  ;;  %v1782_v2 = vadd.f32 1.0, %v2708_v55  ;;  %v2242_v61 = vmul.f32 -1.442695, %v1657_v53  ;;  %v1661_v62 = vadd.f32 %v1660_v59, %v3682_v13 }
 0x51d   : > { %v2710_v0 = vpop.eup %2709  ;;  %2729 = vrcp.f32 %v1781_v56  ;;  %v2243_v1 = vmul.f32 -1.442695, %v1659_v60 }
 0x51e   : > { %v2712_v3 = vpop.eup %2711  ;;  %1871 = vst [vmem:[%s3700_s29 + $0x80] sm:$0xff] %v2710_v0  ;;  %2731 = vrcp.f32 %v1782_v2  ;;  %v2244_v4 = vmul.f32 -1.442695, %v1661_v62 }
 0x51f   : > { %v2714_v5 = vpop.eup %2713  ;;  %1872 = vst [vmem:[%s3700_s29 + $0x88] sm:$0xff] %v2712_v3  ;;  %2733 = vpow2.f32 %v2241_v58 }
 0x520   : > { %v2716_v57 = vpop.eup %2715  ;;  %1873 = vst [vmem:[%s3700_s29 + $0x90] sm:$0xff] %v2714_v5  ;;  %2735 = vpow2.f32 %v2242_v61 }
 0x521   : > { %v2718_v29 = vpop.eup %2717  ;;  %1874 = vst [vmem:[%s3700_s29 + $0x98] sm:$0xff] %v2716_v57  ;;  %2737 = vpow2.f32 %v2243_v1 }
 0x522   : > { %v2720_v6 = vpop.eup %2719  ;;  %v1783_v13 = vadd.f32 1.0, %v2718_v29  ;;  %2739 = vpow2.f32 %v2244_v4 }
 0x523   : > { %v2722_v63 = vpop.eup %2721  ;;  %v1784_v7 = vadd.f32 1.0, %v2720_v6 }
 0x524   : > { %v2724_v8 = vpop.eup %2723  ;;  %2741 = vrcp.f32 %v1783_v13  ;;  %v1785_v14 = vadd.f32 1.0, %v2722_v63 }
 0x525   : > { %v2726_v22 = vpop.eup %2725  ;;  %2743 = vrcp.f32 %v1784_v7  ;;  %v1786_v10 = vadd.f32 1.0, %v2724_v8 }
 0x526   : > { %v2728_v11 = vpop.eup %2727  ;;  %1875 = vst [vmem:[%s3700_s29 + $0xa0] sm:$0xff] %v2726_v22  ;;  %2745 = vrcp.f32 %v1785_v14 }
 0x527   : > { %v2730_v9 = vpop.eup %2729  ;;  %1876 = vst [vmem:[%s3700_s29 + $0xa8] sm:$0xff] %v2728_v11  ;;  %2747 = vrcp.f32 %v1786_v10 }
 0x528   : > { %v2732_v17 = vpop.eup %2731  ;;  %1877 = vst [vmem:[%s3700_s29 + $0xb0] sm:$0xff] %v2730_v9 }
 0x529   : > { %v2734_v15 = vpop.eup %2733  ;;  %1878 = vst [vmem:[%s3700_s29 + $0xb8] sm:$0xff] %v2732_v17 }
 0x52a   : > { %v2736_v16 = vpop.eup %2735  ;;  %v1787_v18 = vadd.f32 1.0, %v2734_v15 }
 0x52b   : > { %v2738_v19 = vpop.eup %2737  ;;  %v1788_v21 = vadd.f32 1.0, %v2736_v16 }
 0x52c   : > { %v2740_v24 = vpop.eup %2739  ;;  %2749 = vrcp.f32 %v1787_v18  ;;  %v1789_v26 = vadd.f32 1.0, %v2738_v19 }
 0x52d   : > { %2751 = vrcp.f32 %v1788_v21  ;;  %v1790_v12 = vadd.f32 1.0, %v2740_v24 }
 0x52e   : > { %v2742_v25 = vpop.eup %2741  ;;  %2753 = vrcp.f32 %v1789_v26 }
 0x52f   : > { %v2744_v23 = vpop.eup %2743  ;;  %1879 = vst [vmem:[%s3700_s29 + $0xc0] sm:$0xff] %v2742_v25  ;;  %2755 = vrcp.f32 %v1790_v12 }
 0x530   : > { %v2746_v27 = vpop.eup %2745  ;;  %1880 = vst [vmem:[%s3700_s29 + $0xc8] sm:$0xff] %v2744_v23 }
 0x531   : > { %v2748_v28 = vpop.eup %2747  ;;  %1881 = vst [vmem:[%s3700_s29 + $0xd0] sm:$0xff] %v2746_v27 }
 0x532   : > { %1882 = vst [vmem:[%s3700_s29 + $0xd8] sm:$0xff] %v2748_v28 }
 0x536   : > { %v2750_v30 = vpop.eup %2749 }
 0x537   : > { %v2752_v31 = vpop.eup %2751  ;;  %1883 = vst [vmem:[%s3700_s29 + $0xe0] sm:$0xff] %v2750_v30 }
 0x538   : > { %v2754_v20 = vpop.eup %2753  ;;  %1884 = vst [vmem:[%s3700_s29 + $0xe8] sm:$0xff] %v2752_v31 }
 0x539   : > { %v2756_v32 = vpop.eup %2755  ;;  %1885 = vst [vmem:[%s3700_s29 + $0xf0] sm:$0xff] %v2754_v20 }
 0x53a   : > { %1886 = vst [vmem:[%s3700_s29 + $0xf8] sm:$0xff] %v2756_v32 }
 0x53b   : > { %2942 = shalt.err (!%p2939_p7)
}
 0x53c   : > { %s2943_s14 = scalar_lea.hbm %s3753_s7, 4096  ;;  %s2947_s5 = scalar_lea.hbm %s3857_s24, 8192 }
 0x53d   : > { %p2944_p12 = scmp.ne.s32.totalorder %s3753_s7, %s2943_s14  ;;  %p2948_p4 = scmp.lt.u32.totalorder %s3753_s7, %s3857_s24 }
 0x53e   : > { %p2949_p0 = scmp.lt.u32.totalorder %s2947_s5, %s2943_s14  ;;  %p2951_p6 = scmp.lt.u32.totalorder %s2943_s14, %s3753_s7 }
 0x53f   : > { %p2945_p2 = pnand %p2944_p12, %p3238_p5 }
 0x540   : > { %p2950_p8 = por %p2949_p0, %p2948_p4 }
 0x541   : > { %p2946_p1 = pneg %p2945_p2 }
 0x542   : > { %p2952_p10 = por %p2951_p6, %p2950_p8 }
 0x544   : > { %p2953_p3 = pnand %p2952_p10, %p2946_p1 }
 0x546   : > { %2956 = shalt.err (!%p2953_p3)
}
 0x547   : > { %s3028_s11 = smov 256   ;;  %s3029_s29 = smov 16  }
 0x548   : > { %2440 = dma.vmem_to_hbm [thread:$0]  (%p3238_p5), %s3755_s23, 4096, %s3753_s7, %s1904_s21, %s3028_s11, %s3028_s11, %s3029_s29  }
 0x549 PF: > { %s3858_s8 = sld [smem:[#allocation20_spill]]  ;;  %s3859_s27 = sld [smem:[#allocation21_spill]] }
 0x54a   : > { %p3861_p13 = scmp.ge.s32.totalorder %s3011_s20, 2 }
 0x54f   : > { %s1954_s22 = sand.u32 1, %s3858_s8   ;;  %p3860_p9 = scmp.ne.s32.totalorder %s3859_s27, 0 }
 0x550   : > { %s1955_s30 = scalar_lea.sflag [#allocation4], %s1954_s22 }
 0x551   : > { %p2462_p11 = pnand %p3861_p13, %p3860_p9 }
 0x553   : > { %2990 = dma.done.wait (!%p2462_p11), %s1955_s30, 4096  }
 0x554   : > { %2992 = vsyncadd (!%p2462_p11), %s1955_s30, 4294963200  ;;  %s1964_s26 = scalar_lea.sflag [#allocation13], %s1954_s22 }
 0x555   : > { %2994 = dma.done.wait (!%p2462_p11), %s1964_s26, 2048  }
 0x556   : > { %2996 = vsyncadd (!%p2462_p11), %s1964_s26, 4294965248  ;;  %s3862_s28 = sld [smem:[#allocation22_spill]]  ;;  %p32_p5 = scmp.ge.s32.totalorder %s3224_s9, 4  }
 0x557   : > { %s3863_s17 = smov %s3003_s18  ;;  %s3864_s18 = smov %s3007_s19 }
 0x558   : > { %s3866_s20 = smov %s3224_s9  ;;  %34 = sbr.rel (!%p32_p5) target bundleno = 18 (0x12), region = 153 }
 0x55c   : > { %s3865_s19 = smov %s3862_s28 }
 0x55f   :  { %1969 = vsyncpa [#allocation3], 1 }
 0x560   :  { %1971 = vsyncpa [#allocation3 + $0x1], 1 }
 0x561   :  { %1972 = vsyncpa [#allocation6], 1 }
 0x562   :  { %1974 = vsyncpa [#allocation6 + $0x1], 1 }
 0x563   :  { %1975 = vsyncpa [#allocation9], 1 }
 0x564   :  { %1976 = vsyncpa [#allocation4], 1 }
 0x565   :  { %1978 = vsyncpa [#allocation4 + $0x1], 1 }
 0x566   :  { %1979 = vsyncpa [#allocation13], 1 }
 0x567   :  { %1981 = vsyncpa [#allocation13 + $0x1], 1 }

</bundles_post_ra>
